<compile_context>
chip_gen: v7x
topology: tpu7x:2x2x1
jax: 0.10.0
libtpu: 0.0.40
codegen_flags: <defaults>
</compile_context>

<pallas_src>
import math

import jax
import jax.numpy as jnp
from jax import lax
from jax.experimental import pallas as pl
from jax.experimental.pallas import tpu as pltpu

_NEG_PAD = -1e30  # bias for padded logit lanes (ignored by log_softmax)


# ----------------------------------------------------------------------------
# small helpers
# ----------------------------------------------------------------------------
def _round_up(x, m):
    return ((x + m - 1) // m) * m


def _pick_divisor(n, cap, multiple=1):
    """Largest d <= cap with d % multiple == 0 and n % d == 0."""
    best = None
    d = multiple
    lim = min(n, cap)
    while d <= lim:
        if n % d == 0:
            best = d
        d += multiple
    if best is None:
        best = multiple if (multiple <= n and n % multiple == 0) else n
    return best


def _row_tile(n, max_tile):
    """Row tile for throughput kernels: multiple of 8, divisor-aware (no big
    padding waste), and leaves >=2 tiles when possible (v7x megacore)."""
    n8 = _round_up(n, 8)
    cap = min(max_tile, n8)
    if n8 >= 16:
        cap = min(cap, max(8, (n8 // 2) // 8 * 8))
    tile = _pick_divisor(n8, cap, 8)
    if tile >= min(cap, 128):
        return tile, n8                       # clean divisor, no extra padding
    tile = min(cap, 128)                      # poor divisor: small bounded pad
    return tile, _round_up(n8, tile)


# ----------------------------------------------------------------------------
# Row-tiled  X @ W + b   (hoisted GRU input projection)
# ----------------------------------------------------------------------------
def _matmul_bias_kernel(x_ref, w_ref, b_ref, o_ref):
    o_ref[...] = (jnp.dot(x_ref[...], w_ref[...],
                          preferred_element_type=jnp.float32) + b_ref[...])


def matmul_bias(x, w, b, *, max_row_tile=512):
    N, K = x.shape
    M = w.shape[1]
    tile, N_pad = _row_tile(N, max_row_tile)
    if N_pad != N:
        x = jnp.pad(x, ((0, N_pad - N), (0, 0)))
    out = pl.pallas_call(
        _matmul_bias_kernel,
        out_shape=jax.ShapeDtypeStruct((N_pad, M), jnp.float32),
        grid_spec=pltpu.PrefetchScalarGridSpec(
            num_scalar_prefetch=0,
            grid=(N_pad // tile,),
            in_specs=[
                pl.BlockSpec((tile, K), lambda i: (i, 0)),
                pl.BlockSpec((K, M), lambda i: (0, 0)),
                pl.BlockSpec((1, M), lambda i: (0, 0)),
            ],
            out_specs=pl.BlockSpec((tile, M), lambda i: (i, 0)),
        ),
        compiler_params=pltpu.CompilerParams(
            dimension_semantics=("parallel",)),
    )(x, w, b)
    return out[:N] if N_pad != N else out


# ----------------------------------------------------------------------------
# GRU recurrence kernel.  Input projection (x W_i + folded biases) is done
# outside; the loop only does h @ W_hh (one fused (H_pad,3H_pad) matmul) + gate
# math.  torch.nn.GRU math:
#   r = sigmoid(xp_r + hp_r)            (biases b_ir+b_hr folded into xp_r)
#   z = sigmoid(xp_z + hp_z)            (biases b_iz+b_hz folded into xp_z)
#   n = tanh(xp_n + r * (hp_n + b_hn))  (b_in folded into xp_n)
#   h' = (1 - z) * n + z * h
# Grid: (batch_tiles ["parallel"], seq_chunks ["arbitrary"]).  The hidden state
# is carried in the loop carry (vregs); the VMEM scratch is touched only at
# chunk boundaries for the cross-chunk carry.
# ----------------------------------------------------------------------------
def _gru_rec_kernel(xp_ref, h0_ref, whh_ref, bhn_ref, out_ref, h_scratch):
    c = pl.program_id(1)

    @pl.when(c == 0)
    def _():
        h_scratch[...] = h0_ref[...]

    chunk, bt, threeH = xp_ref.shape
    Hp = threeH // 3

    whh = whh_ref[...]                                    # resident weights
    bhn = jnp.broadcast_to(bhn_ref[...], (bt, Hp))        # hoisted broadcast
    h_in = h_scratch[...]                                 # read carry once

    def step(t, h_prev):
        hp = jnp.dot(h_prev, whh, preferred_element_type=jnp.float32)
        xp_t = xp_ref[t]                                  # (bt, 3*Hp)
        # gate slices are 128-lane aligned (Hp % 128 == 0) -> free vreg views
        r = jax.nn.sigmoid(xp_t[:, 0:Hp] + hp[:, 0:Hp])
        z = jax.nn.sigmoid(xp_t[:, Hp:2 * Hp] + hp[:, Hp:2 * Hp])
        n = jnp.tanh(xp_t[:, 2 * Hp:3 * Hp] + r * (hp[:, 2 * Hp:3 * Hp] + bhn))
        h_new = (1.0 - z) * n + z * h_prev
        out_ref[t] = h_new                                # lane-dense store
        return h_new

    unroll = chunk if chunk <= 16 else 8
    h_last = lax.fori_loop(0, chunk, step, h_in, unroll=unroll)
    h_scratch[...] = h_last                               # write carry once


def gru_layer(xp_tm, h0, w_hh, b_hn, *, max_seq_chunk=64, max_batch_tile=128,
              vmem_budget=8 * 1024 * 1024):
    """xp_tm: (seq, batch_p, 3*H_pad) pre-projected inputs, h0: (batch_p, H_pad)."""
    seq, batch_p, threeHp = xp_tm.shape
    Hp = h0.shape[-1]

    # batch tile: multiple of 8, divides batch_p, >=2 tiles when possible (v7x)
    cap_bt = min(max_batch_tile, batch_p)
    if batch_p >= 16:
        cap_bt = min(cap_bt, max(8, (batch_p // 2) // 8 * 8))
    batch_tile = _pick_divisor(batch_p, cap_bt, 8)

    # seq chunk: keep double-buffered xp/out blocks + resident weights under a
    # budget that fits every generation's default scoped VMEM (v5e 16 MiB).
    fixed = Hp * threeHp * 4 + 3 * batch_tile * Hp * 4
    per_step = 2 * batch_tile * (threeHp + Hp) * 4
    cap_sc = max(1, min(max_seq_chunk, (vmem_budget - fixed) // per_step))
    if seq <= cap_sc:
        seq_chunk, seq_p = seq, seq
    else:
        d = _pick_divisor(seq, cap_sc, 1)
        if d >= max(8, cap_sc // 4):
            seq_chunk, seq_p = d, seq
        else:
            # awkward (e.g. prime) seq length: pad with junk timesteps instead
            # of degrading to tiny chunks; junk is sliced off below and the
            # final hidden state is read from the real last timestep upstream.
            seq_chunk = cap_sc
            seq_p = _round_up(seq, seq_chunk)
    if seq_p != seq:
        xp_tm = jnp.pad(xp_tm, ((0, seq_p - seq), (0, 0), (0, 0)))

    grid = (batch_p // batch_tile, seq_p // seq_chunk)
    out_tm = pl.pallas_call(
        _gru_rec_kernel,
        out_shape=jax.ShapeDtypeStruct((seq_p, batch_p, Hp), jnp.float32),
        grid_spec=pltpu.PrefetchScalarGridSpec(
            num_scalar_prefetch=0,
            grid=grid,
            in_specs=[
                pl.BlockSpec((seq_chunk, batch_tile, threeHp),
                             lambda b, c: (c, b, 0)),
                pl.BlockSpec((batch_tile, Hp), lambda b, c: (b, 0)),
                pl.BlockSpec((Hp, threeHp), lambda b, c: (0, 0)),
                pl.BlockSpec((1, Hp), lambda b, c: (0, 0)),
            ],
            out_specs=pl.BlockSpec((seq_chunk, batch_tile, Hp),
                                   lambda b, c: (c, b, 0)),
            scratch_shapes=[pltpu.VMEM((batch_tile, Hp), jnp.float32)],
        ),
        compiler_params=pltpu.CompilerParams(
            dimension_semantics=("parallel", "arbitrary")),
    )(xp_tm, h0, w_hh, b_hn)
    return out_tm[:seq] if seq_p != seq else out_tm


# ----------------------------------------------------------------------------
# FC head: relu -> Linear(H,H) -> relu -> Linear(H,O_pad) -> log_softmax.
# Row-tiled; output lane-dense (O padded to a multiple of 128, padded columns
# carry a -1e30 bias so max/sum ignore them; wrapper slices them off).
# Weight/bias padding is done once in init_params.
# ----------------------------------------------------------------------------
def _fc_head_kernel(x_ref, w0_ref, b0_ref, w1_ref, b1_ref, o_ref):
    x = jnp.maximum(x_ref[...], 0.0)                                  # relu(out)
    h = jnp.dot(x, w0_ref[...], preferred_element_type=jnp.float32) + b0_ref[...]
    h = jnp.maximum(h, 0.0)                                           # relu(fc_deep0)
    logits = jnp.dot(h, w1_ref[...], preferred_element_type=jnp.float32) + b1_ref[...]
    m = jnp.max(logits, axis=-1, keepdims=True)
    s = logits - m
    lse = jnp.log(jnp.sum(jnp.exp(s), axis=-1, keepdims=True))
    o_ref[...] = s - lse                                              # log_softmax


def fc_head(x, w0p, b0p, w1p, b1p, *, max_row_tile=512):
    N, Hp = x.shape
    O_pad = w1p.shape[1]
    tile, N_pad = _row_tile(N, max_row_tile)
    if N_pad != N:
        x = jnp.pad(x, ((0, N_pad - N), (0, 0)))
    out = pl.pallas_call(
        _fc_head_kernel,
        out_shape=jax.ShapeDtypeStruct((N_pad, O_pad), jnp.float32),
        grid_spec=pltpu.PrefetchScalarGridSpec(
            num_scalar_prefetch=0,
            grid=(N_pad // tile,),
            in_specs=[
                pl.BlockSpec((tile, Hp), lambda i: (i, 0)),
                pl.BlockSpec((Hp, Hp), lambda i: (0, 0)),
                pl.BlockSpec((1, Hp), lambda i: (0, 0)),
                pl.BlockSpec((Hp, O_pad), lambda i: (0, 0)),
                pl.BlockSpec((1, O_pad), lambda i: (0, 0)),
            ],
            out_specs=pl.BlockSpec((tile, O_pad), lambda i: (i, 0)),
        ),
        compiler_params=pltpu.CompilerParams(
            dimension_semantics=("parallel",)),
    )(x, w0p, b0p, w1p, b1p)
    return out[:N] if N_pad != N else out


# ----------------------------------------------------------------------------
# Parameter construction (torch-style uniform(-1/sqrt(H), 1/sqrt(H))).
# Gate fusion, bias folding, hidden-dim padding to a multiple of 128 (lane-
# aligned gates / lane-dense stores) and FC-head output padding are all done
# here, once, host-side.  Padded lanes are zero everywhere so they stay
# mathematically inert through the whole network.
# ----------------------------------------------------------------------------
def init_params(key, input_dim, hidden_dim, output_dim, n_layers):
    H = hidden_dim
    Hp = _round_up(H, 128)
    O = output_dim
    Op = max(_round_up(O, 128), 128)
    bound = 1.0 / math.sqrt(H)
    params = {"gru": [], "fc": None}

    def pad_gates(w, in_real, in_pad):
        # w: (in_real, 3H) [r|z|n] -> (in_pad, 3*Hp), zero-padded per gate
        out = jnp.zeros((in_pad, 3 * Hp), jnp.float32)
        for g in range(3):
            out = out.at[:in_real, g * Hp:g * Hp + H].set(w[:, g * H:(g + 1) * H])
        return out

    for l in range(n_layers):
        in_real = input_dim if l == 0 else H
        in_pad = input_dim if l == 0 else Hp
        key, k0, k1, k2, k3 = jax.random.split(key, 5)
        w_ih = jax.random.uniform(k0, (3 * H, in_real), jnp.float32, -bound, bound)
        w_hh = jax.random.uniform(k1, (3 * H, H), jnp.float32, -bound, bound)
        b_ih = jax.random.uniform(k2, (3 * H,), jnp.float32, -bound, bound)
        b_hh = jax.random.uniform(k3, (3 * H,), jnp.float32, -bound, bound)

        w_i_all = pad_gates(w_ih.T, in_real, in_pad)      # (in_pad, 3Hp): [r|z|n]
        w_h_all = pad_gates(w_hh.T, H, Hp)                # (Hp, 3Hp):     [r|z|n]

        b_i = jnp.zeros((1, 3 * Hp), jnp.float32)
        b_i = b_i.at[0, 0:H].set(b_ih[0:H] + b_hh[0:H])                    # r
        b_i = b_i.at[0, Hp:Hp + H].set(b_ih[H:2 * H] + b_hh[H:2 * H])      # z
        b_i = b_i.at[0, 2 * Hp:2 * Hp + H].set(b_ih[2 * H:3 * H])          # n (input)
        b_hn = jnp.zeros((1, Hp), jnp.float32).at[0, :H].set(b_hh[2 * H:3 * H])
        params["gru"].append((w_i_all, w_h_all, b_i, b_hn))

    key, k0, k1, k2, k3 = jax.random.split(key, 5)
    w0 = jax.random.uniform(k0, (H, H), jnp.float32, -bound, bound)        # fc_deep0
    b0 = jax.random.uniform(k1, (H,), jnp.float32, -bound, bound)
    w1 = jax.random.uniform(k2, (H, O), jnp.float32, -bound, bound)        # fc
    b1 = jax.random.uniform(k3, (O,), jnp.float32, -bound, bound)
    w0p = jnp.zeros((Hp, Hp), jnp.float32).at[:H, :H].set(w0)
    b0p = jnp.zeros((1, Hp), jnp.float32).at[0, :H].set(b0)
    w1p = jnp.zeros((Hp, Op), jnp.float32).at[:H, :O].set(w1)
    b1p = jnp.full((1, Op), _NEG_PAD, jnp.float32).at[0, :O].set(b1)
    params["fc"] = (w0p, b0p, w1p, b1p)
    return params


# ----------------------------------------------------------------------------
# Full forward (matches GRUNet.forward)
# ----------------------------------------------------------------------------
def grunet_forward(params, x, h, output_dim):
    """x: (batch, seq, input_dim), h: (n_layers, batch, H) ->
       (out: (batch, seq, output_dim), h_out: (n_layers, batch, H))"""
    batch, seq, in_dim = x.shape
    H = h.shape[-1]
    Hp = params["gru"][0][1].shape[0]
    Op = params["fc"][3].shape[1]
    O = output_dim

    # pad batch to a multiple of 8 sublanes and hidden to Hp lanes
    batch_p = _round_up(batch, 8)
    if batch_p != batch:
        x = jnp.pad(x, ((0, batch_p - batch), (0, 0), (0, 0)))
    h = jnp.pad(h, ((0, 0), (0, batch_p - batch), (0, Hp - H)))

    x_tm = jnp.transpose(x, (1, 0, 2))                  # time-major
    layer_flat = x_tm.reshape(seq * batch_p, in_dim)
    h_finals = []
    for l, (w_i_all, w_h_all, b_i, b_hn) in enumerate(params["gru"]):
        # hoisted input projection: one big throughput-friendly matmul
        xp_flat = matmul_bias(layer_flat, w_i_all, b_i)
        xp_tm = xp_flat.reshape(seq, batch_p, 3 * Hp)
        out_tm = gru_layer(xp_tm, h[l], w_h_all, b_hn)
        layer_flat = out_tm.reshape(seq * batch_p, Hp)
        # final hidden = output at the real last timestep (robust to seq padding)
        h_finals.append(out_tm[seq - 1, :batch, :H])
    h_out = jnp.stack(h_finals, axis=0)

    w0p, b0p, w1p, b1p = params["fc"]
    out_flat = fc_head(layer_flat, w0p, b0p, w1p, b1p)
    out_tm = out_flat.reshape(seq, batch_p, Op)[:, :batch, :O]
    out = jnp.transpose(out_tm, (1, 0, 2))              # back to batch_first
    return out, h_out


# ----------------------------------------------------------------------------
# Pure-JAX reference (same math, padded lanes inert) for the correctness check.
# ----------------------------------------------------------------------------
def grunet_forward_ref(params, x, h, output_dim):
    batch, seq, _ = x.shape
    H = h.shape[-1]
    Hp = params["gru"][0][1].shape[0]
    h = jnp.pad(h, ((0, 0), (0, 0), (0, Hp - H)))
    layer_in = jnp.transpose(x, (1, 0, 2))
    h_finals = []
    for l, (w_i, w_h, b_i, b_hn) in enumerate(params["gru"]):
        xp = jnp.einsum("sbi,ij->sbj", layer_in, w_i) + b_i
        h_t = h[l]
        outs = []
        for t in range(seq):
            hp = h_t @ w_h
            r = jax.nn.sigmoid(xp[t, :, 0:Hp] + hp[:, 0:Hp])
            z = jax.nn.sigmoid(xp[t, :, Hp:2 * Hp] + hp[:, Hp:2 * Hp])
            n = jnp.tanh(xp[t, :, 2 * Hp:] + r * (hp[:, 2 * Hp:] + b_hn))
            h_t = (1.0 - z) * n + z * h_t
            outs.append(h_t)
        layer_in = jnp.stack(outs, 0)
        h_finals.append(h_t[:, :H])
    h_out = jnp.stack(h_finals, 0)
    gru_out = jnp.transpose(layer_in, (1, 0, 2))
    w0p, b0p, w1p, b1p = params["fc"]
    a = jnp.maximum(gru_out, 0.0)
    fc0 = jnp.maximum(a @ w0p + b0p, 0.0)
    logits = fc0 @ w1p + b1p
    return jax.nn.log_softmax(logits, axis=-1)[..., :output_dim], h_out


if __name__ == "__main__":
    batch, seq = 2, 8
    input_dim, hidden_dim, output_dim, n_layers = 16, 32, 10, 1

    key = jax.random.PRNGKey(0)
    pkey, xkey = jax.random.split(key)
    params = init_params(pkey, input_dim, hidden_dim, output_dim, n_layers)

    x = jax.random.normal(xkey, (batch, seq, input_dim), jnp.float32)
    h0 = jnp.zeros((n_layers, batch, hidden_dim), jnp.float32)   # init_hidden

    fwd = jax.jit(grunet_forward, static_argnums=3)
    out, h_out = fwd(params, x, h0, output_dim)
    jax.block_until_ready((out, h_out))

    out_ref, h_ref = grunet_forward_ref(params, x, h0, output_dim)
    assert out.shape == (batch, seq, output_dim)
    assert h_out.shape == (n_layers, batch, hidden_dim)
    assert jnp.allclose(out, out_ref, atol=1e-4, rtol=1e-4)
    assert jnp.allclose(h_out, h_ref, atol=1e-4, rtol=1e-4)

    print("KERNEL_OK")
</pallas_src>

<mosaic_0001>
module attributes {stable_mosaic.version = 11 : i64} {
  func.func @_matmul_bias_kernel(%arg0: i32, %arg1: memref<32x16xf32, #tpu.memory_space<vmem>>, %arg2: memref<16x384xf32, #tpu.memory_space<vmem>>, %arg3: memref<1x384xf32, #tpu.memory_space<vmem>>, %arg4: memref<32x384xf32, #tpu.memory_space<vmem>>) attributes {dimension_semantics = [#tpu.dimension_semantics<parallel>], iteration_bounds = array<i64: 2>, scalar_prefetch = 0 : i64, scratch_operands = 0 : i64, tpu.core_type = #tpu.core_type<tc>, window_params = [{transform_indices = @transform_0, window_bounds = array<i64: 32, 16>}, {pipeline_mode = #tpu.pipeline_mode<synchronous>, transform_indices = @transform_1, window_bounds = array<i64: 16, 384>}, {pipeline_mode = #tpu.pipeline_mode<synchronous>, transform_indices = @transform_2, window_bounds = array<i64: 1, 384>}, {transform_indices = @transform_3, window_bounds = array<i64: 32, 384>}]} {
    %c0 = arith.constant 0 : index
    %c0_0 = arith.constant 0 : index
    %0 = vector.load %arg1[%c0, %c0_0] : memref<32x16xf32, #tpu.memory_space<vmem>>, vector<32x16xf32>
    %c0_1 = arith.constant 0 : index
    %c0_2 = arith.constant 0 : index
    %1 = vector.load %arg2[%c0_1, %c0_2] : memref<16x384xf32, #tpu.memory_space<vmem>>, vector<16x384xf32>
    %cst = arith.constant dense<0.000000e+00> : vector<32x384xf32>
    %2 = tpu.matmul %0, %1, %cst {dimension_numbers = #tpu.dot_dimension_numbers<[1], [0], [0], [1], [0, 0, 1, 1], [], []>} : vector<32x16xf32>, vector<16x384xf32>, vector<32x384xf32> -> vector<32x384xf32>
    %c0_3 = arith.constant 0 : index
    %c0_4 = arith.constant 0 : index
    %3 = vector.load %arg3[%c0_3, %c0_4] : memref<1x384xf32, #tpu.memory_space<vmem>>, vector<1x384xf32>
    %4 = vector.broadcast %3 : vector<1x384xf32> to vector<32x384xf32>
    %5 = arith.addf %2, %4 : vector<32x384xf32>
    %c0_5 = arith.constant 0 : index
    %c0_6 = arith.constant 0 : index
    %6 = vector.load %arg4[%c0_5, %c0_6] : memref<32x384xf32, #tpu.memory_space<vmem>>, vector<32x384xf32>
    tpu.vector_store %arg4[%c0_5, %c0_6], %5 {strides = array<i32>} : memref<32x384xf32, #tpu.memory_space<vmem>>, vector<32x384xf32>,
    return
  }
  func.func @transform_0(%arg0: i32) -> (i32, i32) {
    %c0_i32 = arith.constant 0 : i32
    %c0_i32_0 = arith.constant 0 : i32
    return %arg0, %c0_i32 : i32, i32
  }
  func.func @transform_1(%arg0: i32) -> (i32, i32) {
    %c0_i32 = arith.constant 0 : i32
    %c0_i32_0 = arith.constant 0 : i32
    %c0_i32_1 = arith.constant 0 : i32
    return %c0_i32, %c0_i32_0 : i32, i32
  }
  func.func @transform_2(%arg0: i32) -> (i32, i32) {
    %c0_i32 = arith.constant 0 : i32
    %c0_i32_0 = arith.constant 0 : i32
    %c0_i32_1 = arith.constant 0 : i32
    return %c0_i32, %c0_i32_0 : i32, i32
  }
  func.func @transform_3(%arg0: i32) -> (i32, i32) {
    %c0_i32 = arith.constant 0 : i32
    %c0_i32_0 = arith.constant 0 : i32
    return %arg0, %c0_i32 : i32, i32
  }
}

module attributes {stable_mosaic.version = 11 : i64} {
  func.func @_fc_head_kernel(%arg0: i32, %arg1: memref<32x128xf32, #tpu.memory_space<vmem>>, %arg2: memref<128x128xf32, #tpu.memory_space<vmem>>, %arg3: memref<1x128xf32, #tpu.memory_space<vmem>>, %arg4: memref<128x128xf32, #tpu.memory_space<vmem>>, %arg5: memref<1x128xf32, #tpu.memory_space<vmem>>, %arg6: memref<32x128xf32, #tpu.memory_space<vmem>>) attributes {dimension_semantics = [#tpu.dimension_semantics<parallel>], iteration_bounds = array<i64: 2>, scalar_prefetch = 0 : i64, scratch_operands = 0 : i64, tpu.core_type = #tpu.core_type<tc>, window_params = [{transform_indices = @transform_0, window_bounds = array<i64: 32, 128>}, {pipeline_mode = #tpu.pipeline_mode<synchronous>, transform_indices = @transform_1, window_bounds = array<i64: 128, 128>}, {pipeline_mode = #tpu.pipeline_mode<synchronous>, transform_indices = @transform_2, window_bounds = array<i64: 1, 128>}, {pipeline_mode = #tpu.pipeline_mode<synchronous>, transform_indices = @transform_3, window_bounds = array<i64: 128, 128>}, {pipeline_mode = #tpu.pipeline_mode<synchronous>, transform_indices = @transform_4, window_bounds = array<i64: 1, 128>}, {transform_indices = @transform_5, window_bounds = array<i64: 32, 128>}]} {
    %c0 = arith.constant 0 : index
    %c0_0 = arith.constant 0 : index
    %0 = vector.load %arg1[%c0, %c0_0] : memref<32x128xf32, #tpu.memory_space<vmem>>, vector<32x128xf32>
    %cst = arith.constant 0.000000e+00 : f32
    %1 = vector.broadcast %cst : f32 to vector<32x128xf32>
    %2 = arith.maximumf %0, %1 : vector<32x128xf32>
    %c0_1 = arith.constant 0 : index
    %c0_2 = arith.constant 0 : index
    %3 = vector.load %arg2[%c0_1, %c0_2] : memref<128x128xf32, #tpu.memory_space<vmem>>, vector<128x128xf32>
    %cst_3 = arith.constant dense<0.000000e+00> : vector<32x128xf32>
    %4 = tpu.matmul %2, %3, %cst_3 {dimension_numbers = #tpu.dot_dimension_numbers<[1], [0], [0], [1], [0, 0, 1, 1], [], []>} : vector<32x128xf32>, vector<128x128xf32>, vector<32x128xf32> -> vector<32x128xf32>
    %c0_4 = arith.constant 0 : index
    %c0_5 = arith.constant 0 : index
    %5 = vector.load %arg3[%c0_4, %c0_5] : memref<1x128xf32, #tpu.memory_space<vmem>>, vector<1x128xf32>
    %6 = vector.broadcast %5 : vector<1x128xf32> to vector<32x128xf32>
    %7 = arith.addf %4, %6 : vector<32x128xf32>
    %cst_6 = arith.constant 0.000000e+00 : f32
    %8 = vector.broadcast %cst_6 : f32 to vector<32x128xf32>
    %9 = arith.maximumf %7, %8 : vector<32x128xf32>
    %c0_7 = arith.constant 0 : index
    %c0_8 = arith.constant 0 : index
    %10 = vector.load %arg4[%c0_7, %c0_8] : memref<128x128xf32, #tpu.memory_space<vmem>>, vector<128x128xf32>
    %cst_9 = arith.constant dense<0.000000e+00> : vector<32x128xf32>
    %11 = tpu.matmul %9, %10, %cst_9 {dimension_numbers = #tpu.dot_dimension_numbers<[1], [0], [0], [1], [0, 0, 1, 1], [], []>} : vector<32x128xf32>, vector<128x128xf32>, vector<32x128xf32> -> vector<32x128xf32>
    %c0_10 = arith.constant 0 : index
    %c0_11 = arith.constant 0 : index
    %12 = vector.load %arg5[%c0_10, %c0_11] : memref<1x128xf32, #tpu.memory_space<vmem>>, vector<1x128xf32>
    %13 = vector.broadcast %12 : vector<1x128xf32> to vector<32x128xf32>
    %14 = arith.addf %11, %13 : vector<32x128xf32>
    %cst_12 = arith.constant dense<0xFF800000> : vector<32xf32>
    %15 = vector.multi_reduction <maximumf>, %14, %cst_12 [1] : vector<32x128xf32> to vector<32xf32>
    %16 = vector.shape_cast %15 : vector<32xf32> to vector<32x1xf32>
    %17 = vector.broadcast %16 : vector<32x1xf32> to vector<32x128xf32>
    %18 = arith.subf %14, %17 : vector<32x128xf32>
    %19 = math.exp %18 : vector<32x128xf32>
    %cst_13 = arith.constant dense<0.000000e+00> : vector<32xf32>
    %20 = vector.multi_reduction <add>, %19, %cst_13 [1] : vector<32x128xf32> to vector<32xf32>
    %21 = vector.shape_cast %20 : vector<32xf32> to vector<32x1xf32>
    %22 = math.log %21 : vector<32x1xf32>
    %23 = vector.broadcast %22 : vector<32x1xf32> to vector<32x128xf32>
    %24 = arith.subf %18, %23 : vector<32x128xf32>
    %c0_14 = arith.constant 0 : index
    %c0_15 = arith.constant 0 : index
    %25 = vector.load %arg6[%c0_14, %c0_15] : memref<32x128xf32, #tpu.memory_space<vmem>>, vector<32x128xf32>
    tpu.vector_store %arg6[%c0_14, %c0_15], %24 {strides = array<i32>} : memref<32x128xf32, #tpu.memory_space<vmem>>, vector<32x128xf32>,
    return
  }
  func.func @transform_0(%arg0: i32) -> (i32, i32) {
    %c0_i32 = arith.constant 0 : i32
    %c0_i32_0 = arith.constant 0 : i32
    return %arg0, %c0_i32 : i32, i32
  }
  func.func @transform_1(%arg0: i32) -> (i32, i32) {
    %c0_i32 = arith.constant 0 : i32
    %c0_i32_0 = arith.constant 0 : i32
    %c0_i32_1 = arith.constant 0 : i32
    return %c0_i32, %c0_i32_0 : i32, i32
  }
  func.func @transform_2(%arg0: i32) -> (i32, i32) {
    %c0_i32 = arith.constant 0 : i32
    %c0_i32_0 = arith.constant 0 : i32
    %c0_i32_1 = arith.constant 0 : i32
    return %c0_i32, %c0_i32_0 : i32, i32
  }
  func.func @transform_3(%arg0: i32) -> (i32, i32) {
    %c0_i32 = arith.constant 0 : i32
    %c0_i32_0 = arith.constant 0 : i32
    %c0_i32_1 = arith.constant 0 : i32
    return %c0_i32, %c0_i32_0 : i32, i32
  }
  func.func @transform_4(%arg0: i32) -> (i32, i32) {
    %c0_i32 = arith.constant 0 : i32
    %c0_i32_0 = arith.constant 0 : i32
    %c0_i32_1 = arith.constant 0 : i32
    return %c0_i32, %c0_i32_0 : i32, i32
  }
  func.func @transform_5(%arg0: i32) -> (i32, i32) {
    %c0_i32 = arith.constant 0 : i32
    %c0_i32_0 = arith.constant 0 : i32
    return %arg0, %c0_i32 : i32, i32
  }
}

module attributes {stable_mosaic.version = 11 : i64} {
  func.func @_gru_rec_kernel(%arg0: i32, %arg1: i32, %arg2: memref<8x8x384xf32, #tpu.memory_space<vmem>>, %arg3: memref<8x128xf32, #tpu.memory_space<vmem>>, %arg4: memref<128x384xf32, #tpu.memory_space<vmem>>, %arg5: memref<1x128xf32, #tpu.memory_space<vmem>>, %arg6: memref<8x8x128xf32, #tpu.memory_space<vmem>>, %arg7: memref<8x128xf32, #tpu.memory_space<vmem>>) attributes {dimension_semantics = [#tpu.dimension_semantics<parallel>, #tpu.dimension_semantics<arbitrary>], iteration_bounds = array<i64: 1, 1>, scalar_prefetch = 0 : i64, scratch_operands = 1 : i64, tpu.core_type = #tpu.core_type<tc>, window_params = [{transform_indices = @transform_0, window_bounds = array<i64: 8, 8, 384>}, {transform_indices = @transform_1, window_bounds = array<i64: 8, 128>}, {pipeline_mode = #tpu.pipeline_mode<synchronous>, transform_indices = @transform_2, window_bounds = array<i64: 128, 384>}, {pipeline_mode = #tpu.pipeline_mode<synchronous>, transform_indices = @transform_3, window_bounds = array<i64: 1, 128>}, {transform_indices = @transform_4, window_bounds = array<i64: 8, 8, 128>}]} {
    %c0_i32 = arith.constant 0 : i32
    %0 = arith.cmpi eq, %arg1, %c0_i32 : i32
    %1 = arith.extui %0 : i1 to i32
    %c0_i32_0 = arith.constant 0 : i32
    %2 = arith.cmpi ne, %1, %c0_i32_0 : i32
    scf.if %2 {
      %c0_72 = arith.constant 0 : index
      %c0_73 = arith.constant 0 : index
      %289 = vector.load %arg3[%c0_72, %c0_73] : memref<8x128xf32, #tpu.memory_space<vmem>>, vector<8x128xf32>
      %c0_74 = arith.constant 0 : index
      %c0_75 = arith.constant 0 : index
      %290 = vector.load %arg7[%c0_74, %c0_75] : memref<8x128xf32, #tpu.memory_space<vmem>>, vector<8x128xf32>
      tpu.vector_store %arg7[%c0_74, %c0_75], %289 {strides = array<i32>} : memref<8x128xf32, #tpu.memory_space<vmem>>, vector<8x128xf32>,
    } else {
    }
    %c0 = arith.constant 0 : index
    %c0_1 = arith.constant 0 : index
    %3 = vector.load %arg4[%c0, %c0_1] : memref<128x384xf32, #tpu.memory_space<vmem>>, vector<128x384xf32>
    %c0_2 = arith.constant 0 : index
    %c0_3 = arith.constant 0 : index
    %4 = vector.load %arg5[%c0_2, %c0_3] : memref<1x128xf32, #tpu.memory_space<vmem>>, vector<1x128xf32>
    %5 = vector.shape_cast %4 : vector<1x128xf32> to vector<1x128xf32>
    %6 = vector.broadcast %5 : vector<1x128xf32> to vector<8x128xf32>
    %c0_4 = arith.constant 0 : index
    %c0_5 = arith.constant 0 : index
    %7 = vector.load %arg7[%c0_4, %c0_5] : memref<8x128xf32, #tpu.memory_space<vmem>>, vector<8x128xf32>
    %c0_i32_6 = arith.constant 0 : i32
    %cst = arith.constant dense<0.000000e+00> : vector<8x384xf32>
    %8 = tpu.matmul %7, %3, %cst {dimension_numbers = #tpu.dot_dimension_numbers<[1], [0], [0], [1], [0, 0, 1, 1], [], []>} : vector<8x128xf32>, vector<128x384xf32>, vector<8x384xf32> -> vector<8x384xf32>
    %9 = arith.index_cast %c0_i32_6 : i32 to index
    %c0_7 = arith.constant 0 : index
    %c0_8 = arith.constant 0 : index
    %10 = vector.load %arg2[%9, %c0_7, %c0_8] : memref<8x8x384xf32, #tpu.memory_space<vmem>>, vector<1x8x384xf32>
    %11 = vector.shape_cast %10 : vector<1x8x384xf32> to vector<8x384xf32>
    %12 = vector.extract_strided_slice %11 {offsets = [0, 0], sizes = [8, 128], strides = [1, 1]} : vector<8x384xf32> to vector<8x128xf32>
    %13 = vector.extract_strided_slice %8 {offsets = [0, 0], sizes = [8, 128], strides = [1, 1]} : vector<8x384xf32> to vector<8x128xf32>
    %14 = arith.addf %12, %13 : vector<8x128xf32>
    %15 = arith.negf %14 : vector<8x128xf32>
    %16 = math.exp %15 : vector<8x128xf32>
    %cst_9 = arith.constant 1.000000e+00 : f32
    %17 = vector.broadcast %cst_9 : f32 to vector<8x128xf32>
    %18 = arith.addf %17, %16 : vector<8x128xf32>
    %19 = arith.divf %17, %18 : vector<8x128xf32>
    %20 = vector.extract_strided_slice %11 {offsets = [0, 128], sizes = [8, 128], strides = [1, 1]} : vector<8x384xf32> to vector<8x128xf32>
    %21 = vector.extract_strided_slice %8 {offsets = [0, 128], sizes = [8, 128], strides = [1, 1]} : vector<8x384xf32> to vector<8x128xf32>
    %22 = arith.addf %20, %21 : vector<8x128xf32>
    %23 = arith.negf %22 : vector<8x128xf32>
    %24 = math.exp %23 : vector<8x128xf32>
    %cst_10 = arith.constant 1.000000e+00 : f32
    %25 = vector.broadcast %cst_10 : f32 to vector<8x128xf32>
    %26 = arith.addf %25, %24 : vector<8x128xf32>
    %27 = arith.divf %25, %26 : vector<8x128xf32>
    %28 = vector.extract_strided_slice %11 {offsets = [0, 256], sizes = [8, 128], strides = [1, 1]} : vector<8x384xf32> to vector<8x128xf32>
    %29 = vector.extract_strided_slice %8 {offsets = [0, 256], sizes = [8, 128], strides = [1, 1]} : vector<8x384xf32> to vector<8x128xf32>
    %30 = arith.addf %29, %6 : vector<8x128xf32>
    %31 = arith.mulf %19, %30 : vector<8x128xf32>
    %32 = arith.addf %28, %31 : vector<8x128xf32>
    %33 = math.tanh %32 : vector<8x128xf32>
    %cst_11 = arith.constant 1.000000e+00 : f32
    %34 = vector.broadcast %cst_11 : f32 to vector<8x128xf32>
    %35 = arith.subf %34, %27 : vector<8x128xf32>
    %36 = arith.mulf %35, %33 : vector<8x128xf32>
    %37 = arith.mulf %27, %7 : vector<8x128xf32>
    %38 = arith.addf %36, %37 : vector<8x128xf32>
    %39 = arith.index_cast %c0_i32_6 : i32 to index
    %c0_12 = arith.constant 0 : index
    %c0_13 = arith.constant 0 : index
    %40 = vector.load %arg6[%39, %c0_12, %c0_13] : memref<8x8x128xf32, #tpu.memory_space<vmem>>, vector<1x8x128xf32>
    %41 = vector.shape_cast %40 : vector<1x8x128xf32> to vector<8x128xf32>
    %42 = vector.shape_cast %38 : vector<8x128xf32> to vector<1x8x128xf32>
    tpu.vector_store %arg6[%39, %c0_12, %c0_13], %42 {strides = array<i32>} : memref<8x8x128xf32, #tpu.memory_space<vmem>>, vector<1x8x128xf32>,
    %c1_i32 = arith.constant 1 : i32
    %cst_14 = arith.constant dense<0.000000e+00> : vector<8x384xf32>
    %43 = tpu.matmul %38, %3, %cst_14 {dimension_numbers = #tpu.dot_dimension_numbers<[1], [0], [0], [1], [0, 0, 1, 1], [], []>} : vector<8x128xf32>, vector<128x384xf32>, vector<8x384xf32> -> vector<8x384xf32>
    %44 = arith.index_cast %c1_i32 : i32 to index
    %c0_15 = arith.constant 0 : index
    %c0_16 = arith.constant 0 : index
    %45 = vector.load %arg2[%44, %c0_15, %c0_16] : memref<8x8x384xf32, #tpu.memory_space<vmem>>, vector<1x8x384xf32>
    %46 = vector.shape_cast %45 : vector<1x8x384xf32> to vector<8x384xf32>
    %47 = vector.extract_strided_slice %46 {offsets = [0, 0], sizes = [8, 128], strides = [1, 1]} : vector<8x384xf32> to vector<8x128xf32>
    %48 = vector.extract_strided_slice %43 {offsets = [0, 0], sizes = [8, 128], strides = [1, 1]} : vector<8x384xf32> to vector<8x128xf32>
    %49 = arith.addf %47, %48 : vector<8x128xf32>
    %50 = arith.negf %49 : vector<8x128xf32>
    %51 = math.exp %50 : vector<8x128xf32>
    %cst_17 = arith.constant 1.000000e+00 : f32
    %52 = vector.broadcast %cst_17 : f32 to vector<8x128xf32>
    %53 = arith.addf %52, %51 : vector<8x128xf32>
    %54 = arith.divf %52, %53 : vector<8x128xf32>
    %55 = vector.extract_strided_slice %46 {offsets = [0, 128], sizes = [8, 128], strides = [1, 1]} : vector<8x384xf32> to vector<8x128xf32>
    %56 = vector.extract_strided_slice %43 {offsets = [0, 128], sizes = [8, 128], strides = [1, 1]} : vector<8x384xf32> to vector<8x128xf32>
    %57 = arith.addf %55, %56 : vector<8x128xf32>
    %58 = arith.negf %57 : vector<8x128xf32>
    %59 = math.exp %58 : vector<8x128xf32>
    %cst_18 = arith.constant 1.000000e+00 : f32
    %60 = vector.broadcast %cst_18 : f32 to vector<8x128xf32>
    %61 = arith.addf %60, %59 : vector<8x128xf32>
    %62 = arith.divf %60, %61 : vector<8x128xf32>
    %63 = vector.extract_strided_slice %46 {offsets = [0, 256], sizes = [8, 128], strides = [1, 1]} : vector<8x384xf32> to vector<8x128xf32>
    %64 = vector.extract_strided_slice %43 {offsets = [0, 256], sizes = [8, 128], strides = [1, 1]} : vector<8x384xf32> to vector<8x128xf32>
    %65 = arith.addf %64, %6 : vector<8x128xf32>
    %66 = arith.mulf %54, %65 : vector<8x128xf32>
    %67 = arith.addf %63, %66 : vector<8x128xf32>
    %68 = math.tanh %67 : vector<8x128xf32>
    %cst_19 = arith.constant 1.000000e+00 : f32
    %69 = vector.broadcast %cst_19 : f32 to vector<8x128xf32>
    %70 = arith.subf %69, %62 : vector<8x128xf32>
    %71 = arith.mulf %70, %68 : vector<8x128xf32>
    %72 = arith.mulf %62, %38 : vector<8x128xf32>
    %73 = arith.addf %71, %72 : vector<8x128xf32>
    %74 = arith.index_cast %c1_i32 : i32 to index
    %c0_20 = arith.constant 0 : index
    %c0_21 = arith.constant 0 : index
    %75 = vector.load %arg6[%74, %c0_20, %c0_21] : memref<8x8x128xf32, #tpu.memory_space<vmem>>, vector<1x8x128xf32>
    %76 = vector.shape_cast %75 : vector<1x8x128xf32> to vector<8x128xf32>
    %77 = vector.shape_cast %73 : vector<8x128xf32> to vector<1x8x128xf32>
    tpu.vector_store %arg6[%74, %c0_20, %c0_21], %77 {strides = array<i32>} : memref<8x8x128xf32, #tpu.memory_space<vmem>>, vector<1x8x128xf32>,
    %c2_i32 = arith.constant 2 : i32
    %cst_22 = arith.constant dense<0.000000e+00> : vector<8x384xf32>
    %78 = tpu.matmul %73, %3, %cst_22 {dimension_numbers = #tpu.dot_dimension_numbers<[1], [0], [0], [1], [0, 0, 1, 1], [], []>} : vector<8x128xf32>, vector<128x384xf32>, vector<8x384xf32> -> vector<8x384xf32>
    %79 = arith.index_cast %c2_i32 : i32 to index
    %c0_23 = arith.constant 0 : index
    %c0_24 = arith.constant 0 : index
    %80 = vector.load %arg2[%79, %c0_23, %c0_24] : memref<8x8x384xf32, #tpu.memory_space<vmem>>, vector<1x8x384xf32>
    %81 = vector.shape_cast %80 : vector<1x8x384xf32> to vector<8x384xf32>
    %82 = vector.extract_strided_slice %81 {offsets = [0, 0], sizes = [8, 128], strides = [1, 1]} : vector<8x384xf32> to vector<8x128xf32>
    %83 = vector.extract_strided_slice %78 {offsets = [0, 0], sizes = [8, 128], strides = [1, 1]} : vector<8x384xf32> to vector<8x128xf32>
    %84 = arith.addf %82, %83 : vector<8x128xf32>
    %85 = arith.negf %84 : vector<8x128xf32>
    %86 = math.exp %85 : vector<8x128xf32>
    %cst_25 = arith.constant 1.000000e+00 : f32
    %87 = vector.broadcast %cst_25 : f32 to vector<8x128xf32>
    %88 = arith.addf %87, %86 : vector<8x128xf32>
    %89 = arith.divf %87, %88 : vector<8x128xf32>
    %90 = vector.extract_strided_slice %81 {offsets = [0, 128], sizes = [8, 128], strides = [1, 1]} : vector<8x384xf32> to vector<8x128xf32>
    %91 = vector.extract_strided_slice %78 {offsets = [0, 128], sizes = [8, 128], strides = [1, 1]} : vector<8x384xf32> to vector<8x128xf32>
    %92 = arith.addf %90, %91 : vector<8x128xf32>
    %93 = arith.negf %92 : vector<8x128xf32>
    %94 = math.exp %93 : vector<8x128xf32>
    %cst_26 = arith.constant 1.000000e+00 : f32
    %95 = vector.broadcast %cst_26 : f32 to vector<8x128xf32>
    %96 = arith.addf %95, %94 : vector<8x128xf32>
    %97 = arith.divf %95, %96 : vector<8x128xf32>
    %98 = vector.extract_strided_slice %81 {offsets = [0, 256], sizes = [8, 128], strides = [1, 1]} : vector<8x384xf32> to vector<8x128xf32>
    %99 = vector.extract_strided_slice %78 {offsets = [0, 256], sizes = [8, 128], strides = [1, 1]} : vector<8x384xf32> to vector<8x128xf32>
    %100 = arith.addf %99, %6 : vector<8x128xf32>
    %101 = arith.mulf %89, %100 : vector<8x128xf32>
    %102 = arith.addf %98, %101 : vector<8x128xf32>
    %103 = math.tanh %102 : vector<8x128xf32>
    %cst_27 = arith.constant 1.000000e+00 : f32
    %104 = vector.broadcast %cst_27 : f32 to vector<8x128xf32>
    %105 = arith.subf %104, %97 : vector<8x128xf32>
    %106 = arith.mulf %105, %103 : vector<8x128xf32>
    %107 = arith.mulf %97, %73 : vector<8x128xf32>
    %108 = arith.addf %106, %107 : vector<8x128xf32>
    %109 = arith.index_cast %c2_i32 : i32 to index
    %c0_28 = arith.constant 0 : index
    %c0_29 = arith.constant 0 : index
    %110 = vector.load %arg6[%109, %c0_28, %c0_29] : memref<8x8x128xf32, #tpu.memory_space<vmem>>, vector<1x8x128xf32>
    %111 = vector.shape_cast %110 : vector<1x8x128xf32> to vector<8x128xf32>
    %112 = vector.shape_cast %108 : vector<8x128xf32> to vector<1x8x128xf32>
    tpu.vector_store %arg6[%109, %c0_28, %c0_29], %112 {strides = array<i32>} : memref<8x8x128xf32, #tpu.memory_space<vmem>>, vector<1x8x128xf32>,
    %c3_i32 = arith.constant 3 : i32
    %cst_30 = arith.constant dense<0.000000e+00> : vector<8x384xf32>
    %113 = tpu.matmul %108, %3, %cst_30 {dimension_numbers = #tpu.dot_dimension_numbers<[1], [0], [0], [1], [0, 0, 1, 1], [], []>} : vector<8x128xf32>, vector<128x384xf32>, vector<8x384xf32> -> vector<8x384xf32>
    %114 = arith.index_cast %c3_i32 : i32 to index
    %c0_31 = arith.constant 0 : index
    %c0_32 = arith.constant 0 : index
    %115 = vector.load %arg2[%114, %c0_31, %c0_32] : memref<8x8x384xf32, #tpu.memory_space<vmem>>, vector<1x8x384xf32>
    %116 = vector.shape_cast %115 : vector<1x8x384xf32> to vector<8x384xf32>
    %117 = vector.extract_strided_slice %116 {offsets = [0, 0], sizes = [8, 128], strides = [1, 1]} : vector<8x384xf32> to vector<8x128xf32>
    %118 = vector.extract_strided_slice %113 {offsets = [0, 0], sizes = [8, 128], strides = [1, 1]} : vector<8x384xf32> to vector<8x128xf32>
    %119 = arith.addf %117, %118 : vector<8x128xf32>
    %120 = arith.negf %119 : vector<8x128xf32>
    %121 = math.exp %120 : vector<8x128xf32>
    %cst_33 = arith.constant 1.000000e+00 : f32
    %122 = vector.broadcast %cst_33 : f32 to vector<8x128xf32>
    %123 = arith.addf %122, %121 : vector<8x128xf32>
    %124 = arith.divf %122, %123 : vector<8x128xf32>
    %125 = vector.extract_strided_slice %116 {offsets = [0, 128], sizes = [8, 128], strides = [1, 1]} : vector<8x384xf32> to vector<8x128xf32>
    %126 = vector.extract_strided_slice %113 {offsets = [0, 128], sizes = [8, 128], strides = [1, 1]} : vector<8x384xf32> to vector<8x128xf32>
    %127 = arith.addf %125, %126 : vector<8x128xf32>
    %128 = arith.negf %127 : vector<8x128xf32>
    %129 = math.exp %128 : vector<8x128xf32>
    %cst_34 = arith.constant 1.000000e+00 : f32
    %130 = vector.broadcast %cst_34 : f32 to vector<8x128xf32>
    %131 = arith.addf %130, %129 : vector<8x128xf32>
    %132 = arith.divf %130, %131 : vector<8x128xf32>
    %133 = vector.extract_strided_slice %116 {offsets = [0, 256], sizes = [8, 128], strides = [1, 1]} : vector<8x384xf32> to vector<8x128xf32>
    %134 = vector.extract_strided_slice %113 {offsets = [0, 256], sizes = [8, 128], strides = [1, 1]} : vector<8x384xf32> to vector<8x128xf32>
    %135 = arith.addf %134, %6 : vector<8x128xf32>
    %136 = arith.mulf %124, %135 : vector<8x128xf32>
    %137 = arith.addf %133, %136 : vector<8x128xf32>
    %138 = math.tanh %137 : vector<8x128xf32>
    %cst_35 = arith.constant 1.000000e+00 : f32
    %139 = vector.broadcast %cst_35 : f32 to vector<8x128xf32>
    %140 = arith.subf %139, %132 : vector<8x128xf32>
    %141 = arith.mulf %140, %138 : vector<8x128xf32>
    %142 = arith.mulf %132, %108 : vector<8x128xf32>
    %143 = arith.addf %141, %142 : vector<8x128xf32>
    %144 = arith.index_cast %c3_i32 : i32 to index
    %c0_36 = arith.constant 0 : index
    %c0_37 = arith.constant 0 : index
    %145 = vector.load %arg6[%144, %c0_36, %c0_37] : memref<8x8x128xf32, #tpu.memory_space<vmem>>, vector<1x8x128xf32>
    %146 = vector.shape_cast %145 : vector<1x8x128xf32> to vector<8x128xf32>
    %147 = vector.shape_cast %143 : vector<8x128xf32> to vector<1x8x128xf32>
    tpu.vector_store %arg6[%144, %c0_36, %c0_37], %147 {strides = array<i32>} : memref<8x8x128xf32, #tpu.memory_space<vmem>>, vector<1x8x128xf32>,
    %c4_i32 = arith.constant 4 : i32
    %cst_38 = arith.constant dense<0.000000e+00> : vector<8x384xf32>
    %148 = tpu.matmul %143, %3, %cst_38 {dimension_numbers = #tpu.dot_dimension_numbers<[1], [0], [0], [1], [0, 0, 1, 1], [], []>} : vector<8x128xf32>, vector<128x384xf32>, vector<8x384xf32> -> vector<8x384xf32>
    %149 = arith.index_cast %c4_i32 : i32 to index
    %c0_39 = arith.constant 0 : index
    %c0_40 = arith.constant 0 : index
    %150 = vector.load %arg2[%149, %c0_39, %c0_40] : memref<8x8x384xf32, #tpu.memory_space<vmem>>, vector<1x8x384xf32>
    %151 = vector.shape_cast %150 : vector<1x8x384xf32> to vector<8x384xf32>
    %152 = vector.extract_strided_slice %151 {offsets = [0, 0], sizes = [8, 128], strides = [1, 1]} : vector<8x384xf32> to vector<8x128xf32>
    %153 = vector.extract_strided_slice %148 {offsets = [0, 0], sizes = [8, 128], strides = [1, 1]} : vector<8x384xf32> to vector<8x128xf32>
    %154 = arith.addf %152, %153 : vector<8x128xf32>
    %155 = arith.negf %154 : vector<8x128xf32>
    %156 = math.exp %155 : vector<8x128xf32>
    %cst_41 = arith.constant 1.000000e+00 : f32
    %157 = vector.broadcast %cst_41 : f32 to vector<8x128xf32>
    %158 = arith.addf %157, %156 : vector<8x128xf32>
    %159 = arith.divf %157, %158 : vector<8x128xf32>
    %160 = vector.extract_strided_slice %151 {offsets = [0, 128], sizes = [8, 128], strides = [1, 1]} : vector<8x384xf32> to vector<8x128xf32>
    %161 = vector.extract_strided_slice %148 {offsets = [0, 128], sizes = [8, 128], strides = [1, 1]} : vector<8x384xf32> to vector<8x128xf32>
    %162 = arith.addf %160, %161 : vector<8x128xf32>
    %163 = arith.negf %162 : vector<8x128xf32>
    %164 = math.exp %163 : vector<8x128xf32>
    %cst_42 = arith.constant 1.000000e+00 : f32
    %165 = vector.broadcast %cst_42 : f32 to vector<8x128xf32>
    %166 = arith.addf %165, %164 : vector<8x128xf32>
    %167 = arith.divf %165, %166 : vector<8x128xf32>
    %168 = vector.extract_strided_slice %151 {offsets = [0, 256], sizes = [8, 128], strides = [1, 1]} : vector<8x384xf32> to vector<8x128xf32>
    %169 = vector.extract_strided_slice %148 {offsets = [0, 256], sizes = [8, 128], strides = [1, 1]} : vector<8x384xf32> to vector<8x128xf32>
    %170 = arith.addf %169, %6 : vector<8x128xf32>
    %171 = arith.mulf %159, %170 : vector<8x128xf32>
    %172 = arith.addf %168, %171 : vector<8x128xf32>
    %173 = math.tanh %172 : vector<8x128xf32>
    %cst_43 = arith.constant 1.000000e+00 : f32
    %174 = vector.broadcast %cst_43 : f32 to vector<8x128xf32>
    %175 = arith.subf %174, %167 : vector<8x128xf32>
    %176 = arith.mulf %175, %173 : vector<8x128xf32>
    %177 = arith.mulf %167, %143 : vector<8x128xf32>
    %178 = arith.addf %176, %177 : vector<8x128xf32>
    %179 = arith.index_cast %c4_i32 : i32 to index
    %c0_44 = arith.constant 0 : index
    %c0_45 = arith.constant 0 : index
    %180 = vector.load %arg6[%179, %c0_44, %c0_45] : memref<8x8x128xf32, #tpu.memory_space<vmem>>, vector<1x8x128xf32>
    %181 = vector.shape_cast %180 : vector<1x8x128xf32> to vector<8x128xf32>
    %182 = vector.shape_cast %178 : vector<8x128xf32> to vector<1x8x128xf32>
    tpu.vector_store %arg6[%179, %c0_44, %c0_45], %182 {strides = array<i32>} : memref<8x8x128xf32, #tpu.memory_space<vmem>>, vector<1x8x128xf32>,
    %c5_i32 = arith.constant 5 : i32
    %cst_46 = arith.constant dense<0.000000e+00> : vector<8x384xf32>
    %183 = tpu.matmul %178, %3, %cst_46 {dimension_numbers = #tpu.dot_dimension_numbers<[1], [0], [0], [1], [0, 0, 1, 1], [], []>} : vector<8x128xf32>, vector<128x384xf32>, vector<8x384xf32> -> vector<8x384xf32>
    %184 = arith.index_cast %c5_i32 : i32 to index
    %c0_47 = arith.constant 0 : index
    %c0_48 = arith.constant 0 : index
    %185 = vector.load %arg2[%184, %c0_47, %c0_48] : memref<8x8x384xf32, #tpu.memory_space<vmem>>, vector<1x8x384xf32>
    %186 = vector.shape_cast %185 : vector<1x8x384xf32> to vector<8x384xf32>
    %187 = vector.extract_strided_slice %186 {offsets = [0, 0], sizes = [8, 128], strides = [1, 1]} : vector<8x384xf32> to vector<8x128xf32>
    %188 = vector.extract_strided_slice %183 {offsets = [0, 0], sizes = [8, 128], strides = [1, 1]} : vector<8x384xf32> to vector<8x128xf32>
    %189 = arith.addf %187, %188 : vector<8x128xf32>
    %190 = arith.negf %189 : vector<8x128xf32>
    %191 = math.exp %190 : vector<8x128xf32>
    %cst_49 = arith.constant 1.000000e+00 : f32
    %192 = vector.broadcast %cst_49 : f32 to vector<8x128xf32>
    %193 = arith.addf %192, %191 : vector<8x128xf32>
    %194 = arith.divf %192, %193 : vector<8x128xf32>
    %195 = vector.extract_strided_slice %186 {offsets = [0, 128], sizes = [8, 128], strides = [1, 1]} : vector<8x384xf32> to vector<8x128xf32>
    %196 = vector.extract_strided_slice %183 {offsets = [0, 128], sizes = [8, 128], strides = [1, 1]} : vector<8x384xf32> to vector<8x128xf32>
    %197 = arith.addf %195, %196 : vector<8x128xf32>
    %198 = arith.negf %197 : vector<8x128xf32>
    %199 = math.exp %198 : vector<8x128xf32>
    %cst_50 = arith.constant 1.000000e+00 : f32
    %200 = vector.broadcast %cst_50 : f32 to vector<8x128xf32>
    %201 = arith.addf %200, %199 : vector<8x128xf32>
    %202 = arith.divf %200, %201 : vector<8x128xf32>
    %203 = vector.extract_strided_slice %186 {offsets = [0, 256], sizes = [8, 128], strides = [1, 1]} : vector<8x384xf32> to vector<8x128xf32>
    %204 = vector.extract_strided_slice %183 {offsets = [0, 256], sizes = [8, 128], strides = [1, 1]} : vector<8x384xf32> to vector<8x128xf32>
    %205 = arith.addf %204, %6 : vector<8x128xf32>
    %206 = arith.mulf %194, %205 : vector<8x128xf32>
    %207 = arith.addf %203, %206 : vector<8x128xf32>
    %208 = math.tanh %207 : vector<8x128xf32>
    %cst_51 = arith.constant 1.000000e+00 : f32
    %209 = vector.broadcast %cst_51 : f32 to vector<8x128xf32>
    %210 = arith.subf %209, %202 : vector<8x128xf32>
    %211 = arith.mulf %210, %208 : vector<8x128xf32>
    %212 = arith.mulf %202, %178 : vector<8x128xf32>
    %213 = arith.addf %211, %212 : vector<8x128xf32>
    %214 = arith.index_cast %c5_i32 : i32 to index
    %c0_52 = arith.constant 0 : index
    %c0_53 = arith.constant 0 : index
    %215 = vector.load %arg6[%214, %c0_52, %c0_53] : memref<8x8x128xf32, #tpu.memory_space<vmem>>, vector<1x8x128xf32>
    %216 = vector.shape_cast %215 : vector<1x8x128xf32> to vector<8x128xf32>
    %217 = vector.shape_cast %213 : vector<8x128xf32> to vector<1x8x128xf32>
    tpu.vector_store %arg6[%214, %c0_52, %c0_53], %217 {strides = array<i32>} : memref<8x8x128xf32, #tpu.memory_space<vmem>>, vector<1x8x128xf32>,
    %c6_i32 = arith.constant 6 : i32
    %cst_54 = arith.constant dense<0.000000e+00> : vector<8x384xf32>
    %218 = tpu.matmul %213, %3, %cst_54 {dimension_numbers = #tpu.dot_dimension_numbers<[1], [0], [0], [1], [0, 0, 1, 1], [], []>} : vector<8x128xf32>, vector<128x384xf32>, vector<8x384xf32> -> vector<8x384xf32>
    %219 = arith.index_cast %c6_i32 : i32 to index
    %c0_55 = arith.constant 0 : index
    %c0_56 = arith.constant 0 : index
    %220 = vector.load %arg2[%219, %c0_55, %c0_56] : memref<8x8x384xf32, #tpu.memory_space<vmem>>, vector<1x8x384xf32>
    %221 = vector.shape_cast %220 : vector<1x8x384xf32> to vector<8x384xf32>
    %222 = vector.extract_strided_slice %221 {offsets = [0, 0], sizes = [8, 128], strides = [1, 1]} : vector<8x384xf32> to vector<8x128xf32>
    %223 = vector.extract_strided_slice %218 {offsets = [0, 0], sizes = [8, 128], strides = [1, 1]} : vector<8x384xf32> to vector<8x128xf32>
    %224 = arith.addf %222, %223 : vector<8x128xf32>
    %225 = arith.negf %224 : vector<8x128xf32>
    %226 = math.exp %225 : vector<8x128xf32>
    %cst_57 = arith.constant 1.000000e+00 : f32
    %227 = vector.broadcast %cst_57 : f32 to vector<8x128xf32>
    %228 = arith.addf %227, %226 : vector<8x128xf32>
    %229 = arith.divf %227, %228 : vector<8x128xf32>
    %230 = vector.extract_strided_slice %221 {offsets = [0, 128], sizes = [8, 128], strides = [1, 1]} : vector<8x384xf32> to vector<8x128xf32>
    %231 = vector.extract_strided_slice %218 {offsets = [0, 128], sizes = [8, 128], strides = [1, 1]} : vector<8x384xf32> to vector<8x128xf32>
    %232 = arith.addf %230, %231 : vector<8x128xf32>
    %233 = arith.negf %232 : vector<8x128xf32>
    %234 = math.exp %233 : vector<8x128xf32>
    %cst_58 = arith.constant 1.000000e+00 : f32
    %235 = vector.broadcast %cst_58 : f32 to vector<8x128xf32>
    %236 = arith.addf %235, %234 : vector<8x128xf32>
    %237 = arith.divf %235, %236 : vector<8x128xf32>
    %238 = vector.extract_strided_slice %221 {offsets = [0, 256], sizes = [8, 128], strides = [1, 1]} : vector<8x384xf32> to vector<8x128xf32>
    %239 = vector.extract_strided_slice %218 {offsets = [0, 256], sizes = [8, 128], strides = [1, 1]} : vector<8x384xf32> to vector<8x128xf32>
    %240 = arith.addf %239, %6 : vector<8x128xf32>
    %241 = arith.mulf %229, %240 : vector<8x128xf32>
    %242 = arith.addf %238, %241 : vector<8x128xf32>
    %243 = math.tanh %242 : vector<8x128xf32>
    %cst_59 = arith.constant 1.000000e+00 : f32
    %244 = vector.broadcast %cst_59 : f32 to vector<8x128xf32>
    %245 = arith.subf %244, %237 : vector<8x128xf32>
    %246 = arith.mulf %245, %243 : vector<8x128xf32>
    %247 = arith.mulf %237, %213 : vector<8x128xf32>
    %248 = arith.addf %246, %247 : vector<8x128xf32>
    %249 = arith.index_cast %c6_i32 : i32 to index
    %c0_60 = arith.constant 0 : index
    %c0_61 = arith.constant 0 : index
    %250 = vector.load %arg6[%249, %c0_60, %c0_61] : memref<8x8x128xf32, #tpu.memory_space<vmem>>, vector<1x8x128xf32>
    %251 = vector.shape_cast %250 : vector<1x8x128xf32> to vector<8x128xf32>
    %252 = vector.shape_cast %248 : vector<8x128xf32> to vector<1x8x128xf32>
    tpu.vector_store %arg6[%249, %c0_60, %c0_61], %252 {strides = array<i32>} : memref<8x8x128xf32, #tpu.memory_space<vmem>>, vector<1x8x128xf32>,
    %c7_i32 = arith.constant 7 : i32
    %cst_62 = arith.constant dense<0.000000e+00> : vector<8x384xf32>
    %253 = tpu.matmul %248, %3, %cst_62 {dimension_numbers = #tpu.dot_dimension_numbers<[1], [0], [0], [1], [0, 0, 1, 1], [], []>} : vector<8x128xf32>, vector<128x384xf32>, vector<8x384xf32> -> vector<8x384xf32>
    %254 = arith.index_cast %c7_i32 : i32 to index
    %c0_63 = arith.constant 0 : index
    %c0_64 = arith.constant 0 : index
    %255 = vector.load %arg2[%254, %c0_63, %c0_64] : memref<8x8x384xf32, #tpu.memory_space<vmem>>, vector<1x8x384xf32>
    %256 = vector.shape_cast %255 : vector<1x8x384xf32> to vector<8x384xf32>
    %257 = vector.extract_strided_slice %256 {offsets = [0, 0], sizes = [8, 128], strides = [1, 1]} : vector<8x384xf32> to vector<8x128xf32>
    %258 = vector.extract_strided_slice %253 {offsets = [0, 0], sizes = [8, 128], strides = [1, 1]} : vector<8x384xf32> to vector<8x128xf32>
    %259 = arith.addf %257, %258 : vector<8x128xf32>
    %260 = arith.negf %259 : vector<8x128xf32>
    %261 = math.exp %260 : vector<8x128xf32>
    %cst_65 = arith.constant 1.000000e+00 : f32
    %262 = vector.broadcast %cst_65 : f32 to vector<8x128xf32>
    %263 = arith.addf %262, %261 : vector<8x128xf32>
    %264 = arith.divf %262, %263 : vector<8x128xf32>
    %265 = vector.extract_strided_slice %256 {offsets = [0, 128], sizes = [8, 128], strides = [1, 1]} : vector<8x384xf32> to vector<8x128xf32>
    %266 = vector.extract_strided_slice %253 {offsets = [0, 128], sizes = [8, 128], strides = [1, 1]} : vector<8x384xf32> to vector<8x128xf32>
    %267 = arith.addf %265, %266 : vector<8x128xf32>
    %268 = arith.negf %267 : vector<8x128xf32>
    %269 = math.exp %268 : vector<8x128xf32>
    %cst_66 = arith.constant 1.000000e+00 : f32
    %270 = vector.broadcast %cst_66 : f32 to vector<8x128xf32>
    %271 = arith.addf %270, %269 : vector<8x128xf32>
    %272 = arith.divf %270, %271 : vector<8x128xf32>
    %273 = vector.extract_strided_slice %256 {offsets = [0, 256], sizes = [8, 128], strides = [1, 1]} : vector<8x384xf32> to vector<8x128xf32>
    %274 = vector.extract_strided_slice %253 {offsets = [0, 256], sizes = [8, 128], strides = [1, 1]} : vector<8x384xf32> to vector<8x128xf32>
    %275 = arith.addf %274, %6 : vector<8x128xf32>
    %276 = arith.mulf %264, %275 : vector<8x128xf32>
    %277 = arith.addf %273, %276 : vector<8x128xf32>
    %278 = math.tanh %277 : vector<8x128xf32>
    %cst_67 = arith.constant 1.000000e+00 : f32
    %279 = vector.broadcast %cst_67 : f32 to vector<8x128xf32>
    %280 = arith.subf %279, %272 : vector<8x128xf32>
    %281 = arith.mulf %280, %278 : vector<8x128xf32>
    %282 = arith.mulf %272, %248 : vector<8x128xf32>
    %283 = arith.addf %281, %282 : vector<8x128xf32>
    %284 = arith.index_cast %c7_i32 : i32 to index
    %c0_68 = arith.constant 0 : index
    %c0_69 = arith.constant 0 : index
    %285 = vector.load %arg6[%284, %c0_68, %c0_69] : memref<8x8x128xf32, #tpu.memory_space<vmem>>, vector<1x8x128xf32>
    %286 = vector.shape_cast %285 : vector<1x8x128xf32> to vector<8x128xf32>
    %287 = vector.shape_cast %283 : vector<8x128xf32> to vector<1x8x128xf32>
    tpu.vector_store %arg6[%284, %c0_68, %c0_69], %287 {strides = array<i32>} : memref<8x8x128xf32, #tpu.memory_space<vmem>>, vector<1x8x128xf32>,
    %c8_i32 = arith.constant 8 : i32
    %c0_70 = arith.constant 0 : index
    %c0_71 = arith.constant 0 : index
    %288 = vector.load %arg7[%c0_70, %c0_71] : memref<8x128xf32, #tpu.memory_space<vmem>>, vector<8x128xf32>
    tpu.vector_store %arg7[%c0_70, %c0_71], %283 {strides = array<i32>} : memref<8x128xf32, #tpu.memory_space<vmem>>, vector<8x128xf32>,
    return
  }
  func.func @transform_0(%arg0: i32, %arg1: i32) -> (i32, i32, i32) {
    %c0_i32 = arith.constant 0 : i32
    %c0_i32_0 = arith.constant 0 : i32
    return %arg1, %arg0, %c0_i32 : i32, i32, i32
  }
  func.func @transform_1(%arg0: i32, %arg1: i32) -> (i32, i32) {
    %c0_i32 = arith.constant 0 : i32
    %c0_i32_0 = arith.constant 0 : i32
    return %arg0, %c0_i32 : i32, i32
  }
  func.func @transform_2(%arg0: i32, %arg1: i32) -> (i32, i32) {
    %c0_i32 = arith.constant 0 : i32
    %c0_i32_0 = arith.constant 0 : i32
    %c0_i32_1 = arith.constant 0 : i32
    return %c0_i32, %c0_i32_0 : i32, i32
  }
  func.func @transform_3(%arg0: i32, %arg1: i32) -> (i32, i32) {
    %c0_i32 = arith.constant 0 : i32
    %c0_i32_0 = arith.constant 0 : i32
    %c0_i32_1 = arith.constant 0 : i32
    return %c0_i32, %c0_i32_0 : i32, i32
  }
  func.func @transform_4(%arg0: i32, %arg1: i32) -> (i32, i32, i32) {
    %c0_i32 = arith.constant 0 : i32
    %c0_i32_0 = arith.constant 0 : i32
    return %arg1, %arg0, %c0_i32 : i32, i32, i32
  }
}

</mosaic_0001>

<bundles_post_ra>
// kernel: grunet_forward.5
= control target key start
LH: loop header
LB: loop body
LE: loop exit
PB: predicated region body
PF: predicated region fallthrough
CT: control target
= control target key end

     0   :  { %s811_s18 = smov 0   ;;  %s943_s0 = inlined_call_operand.vmem [shape: f32[64,128], index: 0, kind: input, shape index: {}]   ;;  %s944_s1 = inlined_call_operand.vmem [shape: f32[128,128], index: 1, kind: input, shape index: {}]   ;;  %s945_s2 = inlined_call_operand.vmem [shape: f32[1,128], index: 2, kind: input, shape index: {}]   ;;  %s946_s3 = inlined_call_operand.vmem [shape: f32[128,128], index: 3, kind: input, shape index: {}]   ;;  %s947_s4 = inlined_call_operand.vmem [shape: f32[1,128], index: 4, kind: input, shape index: {}]   ;;  %s948_s5 = inlined_call_operand.vmem [shape: f32[64,128], index: 5, kind: output, shape index: {}]  }
   0x1 LB: > { %s556_s19 = sadd.s32 4294967295, %s779_s18   ;;  %p560_p0 = scmp.ge.s32.totalorder %s779_s18, 1  ;;  %s779_s18 = sphi %s811_s18, %s15_s18  }
   0x2   : > { %p188_p1 = scmp.lt.s32.totalorder %s779_s18, 3 }
   0x4   : > { %p189_p2 = pnand %p560_p0, %p188_p1 }
   0x5   : > { %v236_v0 = vld [vmem:[%s944_s1] sm:$0xff] (!%p189_p2)  ;;  %v237_v1 = vld [vmem:[%s944_s1 + $0x8] sm:$0xff] (!%p189_p2)  ;;  %v238_v2 = vld [vmem:[%s944_s1 + $0x10] sm:$0xff] (!%p189_p2)  ;;  %s561_s26 = sshll.u32 (!%p189_p2), %s556_s19, 2 }
   0x6   : > { %192 = sbr.rel (%p189_p2) target bundleno = 797 (0x31d), region = 40  ;;  %v685_v3 = vpack.c.bf16 (!%p189_p2), %v237_v1, %v236_v0  ;;  %v239_v4 = vld [vmem:[%s944_s1 + $0x18] sm:$0xff] (!%p189_p2)  ;;  %p217_p3 = scmp.lt.s32.totalorder (!%p189_p2), %s561_s26, 7  ;;  %v240_v6 = vld [vmem:[%s944_s1 + $0x20] sm:$0xff] (!%p189_p2)  ;;  %v241_v7 = vld [vmem:[%s944_s1 + $0x28] sm:$0xff] (!%p189_p2) }
   0x7   : > { %v689_v5 = vpack.c.bf16 (!%p189_p2), %v239_v4, %v238_v2  ;;  %v693_v8 = vpack.c.bf16 (!%p189_p2), %v241_v7, %v240_v6  ;;  %v242_v9 = vld [vmem:[%s944_s1 + $0x30] sm:$0xff] (!%p189_p2)  ;;  %v348_v10 = vld [vmem:[%s946_s3] sm:$0xff] (!%p189_p2)  ;;  %v349_v11 = vld [vmem:[%s946_s3 + $0x8] sm:$0xff] (!%p189_p2) }
   0x8   : > { %686 = vmatprep.subr.bf16.mxu0 (!%p189_p2), %v685_v3  ;;  %v243_v12 = vld [vmem:[%s944_s1 + $0x38] sm:$0xff] (!%p189_p2)  ;;  %v717_v13 = vpack.c.bf16 (!%p189_p2), %v349_v11, %v348_v10  ;;  %v350_v14 = vld [vmem:[%s946_s3 + $0x10] sm:$0xff] (!%p189_p2)  ;;  %v352_v18 = vld [vmem:[%s946_s3 + $0x20] sm:$0xff] (!%p189_p2) }
   0x9   : > { %688 = vmatpush3.bf16.msra.mxu0 (!%p189_p2), %v685_v3  ;;  %v351_v15 = vld [vmem:[%s946_s3 + $0x18] sm:$0xff] (!%p189_p2)  ;;  %v353_v20 = vld [vmem:[%s946_s3 + $0x28] sm:$0xff] (!%p189_p2)  ;;  %v697_v21 = vpack.c.bf16 (!%p189_p2), %v243_v12, %v242_v9  ;;  %v244_v22 = vld [vmem:[%s944_s1 + $0x40] sm:$0xff] (!%p189_p2) }
   0xa   : > { %690 = vmatprep.subr.bf16.mxu0 (!%p189_p2), %v689_v5  ;;  %v721_v17 = vpack.c.bf16 (!%p189_p2), %v351_v15, %v350_v14  ;;  %718 = vmatprep.subr.bf16.mxu1 (!%p189_p2), %v717_v13  ;;  %v245_v23 = vld [vmem:[%s944_s1 + $0x48] sm:$0xff] (!%p189_p2)  ;;  %v725_v24 = vpack.c.bf16 (!%p189_p2), %v353_v20, %v352_v18  ;;  %v354_v25 = vld [vmem:[%s946_s3 + $0x30] sm:$0xff] (!%p189_p2)  ;;  %v355_v26 = vld [vmem:[%s946_s3 + $0x38] sm:$0xff] (!%p189_p2) }
   0xb   : > { %720 = vmatpush3.bf16.msra.mxu1 (!%p189_p2), %v717_v13  ;;  %v701_v27 = vpack.c.bf16 (!%p189_p2), %v245_v23, %v244_v22  ;;  %v246_v28 = vld [vmem:[%s944_s1 + $0x50] sm:$0xff] (!%p189_p2)  ;;  %v247_v29 = vld [vmem:[%s944_s1 + $0x58] sm:$0xff] (!%p189_p2)  ;;  %v729_v30 = vpack.c.bf16 (!%p189_p2), %v355_v26, %v354_v25  ;;  %v356_v31 = vld [vmem:[%s946_s3 + $0x40] sm:$0xff] (!%p189_p2) }
   0xc   : > { %722 = vmatprep.subr.bf16.mxu1 (!%p189_p2), %v721_v17  ;;  %v357_v32 = vld [vmem:[%s946_s3 + $0x48] sm:$0xff] (!%p189_p2)  ;;  %v705_v33 = vpack.c.bf16 (!%p189_p2), %v247_v29, %v246_v28  ;;  %v248_v34 = vld [vmem:[%s944_s1 + $0x60] sm:$0xff] (!%p189_p2)  ;;  %v358_v37 = vld [vmem:[%s946_s3 + $0x50] sm:$0xff] (!%p189_p2) }
   0xd   : > { %s950_s26 = smov (!%p217_p3, %s561_s26), 7  ;;  %692 = vmatpush3.bf16.msra.mxu0 %v689_v5  ;;  %v249_v35 = vld [vmem:[%s944_s1 + $0x68] sm:$0xff]  ;;  %v733_v36 = vpack.c.bf16 %v357_v32, %v356_v31  ;;  %v359_v38 = vld [vmem:[%s946_s3 + $0x58] sm:$0xff]  ;;  %v250_v40 = vld [vmem:[%s944_s1 + $0x70] sm:$0xff] }
   0xe   : > { %s562_s10 = sshll.u32 %s950_s26, 3  ;;  %694 = vmatprep.subr.bf16.mxu0 %v693_v8  ;;  %v709_v39 = vpack.c.bf16 %v249_v35, %v248_v34  ;;  %v251_v41 = vld [vmem:[%s944_s1 + $0x78] sm:$0xff]  ;;  %v737_v42 = vpack.c.bf16 %v359_v38, %v358_v37  ;;  %v360_v43 = vld [vmem:[%s946_s3 + $0x60] sm:$0xff]  ;;  %v361_v44 = vld [vmem:[%s946_s3 + $0x68] sm:$0xff] }
   0xf   : > { %s857_s20 = scalar_lea.vmem %s943_s0, %s562_s10  ;;  %724 = vmatpush3.bf16.msra.mxu1 %v721_v17  ;;  %v713_v45 = vpack.c.bf16 %v251_v41, %v250_v40  ;;  %v741_v46 = vpack.c.bf16 %v361_v44, %v360_v43  ;;  %v362_v53 = vld [vmem:[%s946_s3 + $0x70] sm:$0xff]  ;;  %v363_v54 = vld [vmem:[%s946_s3 + $0x78] sm:$0xff]  ;;  %v565_v56 = vld [vmem:[%s945_s2] ss:$0 sm:$0xff]  ;;  %s226_s29 = scalar_lea.vmem %s948_s5, %s562_s10 }
  0x10   : > { %v228_v16 = vld [vmem:[%s857_s20] sm:$0xff]  ;;  %726 = vmatprep.subr.bf16.mxu1 %v725_v24  ;;  %v229_v47 = vld [vmem:[%s857_s20 + $0x8] sm:$0xff]  ;;  %v230_v48 = vld [vmem:[%s857_s20 + $0x10] sm:$0xff]  ;;  %v745_v55 = vpack.c.bf16 %v363_v54, %v362_v53 }
  0x11   : > { %v232_v19 = vmax.f32 %v228_v16, 0.0  ;;  %696 = vmatpush3.bf16.msra.mxu0 %v693_v8  ;;  %v233_v49 = vmax.f32 %v229_v47, 0.0  ;;  %v234_v50 = vmax.f32 %v230_v48, 0.0  ;;  %v231_v51 = vld [vmem:[%s857_s20 + $0x18] sm:$0xff]  ;;  %v566_v5 = vld [vmem:[%s947_s4] ss:$0 sm:$0xff] }
  0x12   : > { %698 = vmatprep.subr.bf16.mxu0 %v697_v21  ;;  %v235_v52 = vmax.f32 %v231_v51, 0.0 }
  0x13   : > { %641 = vmatprep.mubr.f32.mxu0 %v232_v19  ;;  %728 = vmatpush3.bf16.msra.mxu1 %v725_v24 }
  0x14   : > { %730 = vmatprep.subr.bf16.mxu1 %v729_v30 }
  0x15   : > { %700 = vmatpush3.bf16.msra.mxu0 %v697_v21 }
  0x16   : > { %702 = vmatprep.subr.bf16.mxu0 %v701_v27 }
  0x17   : > { %732 = vmatpush3.bf16.msra.mxu1 %v729_v30 }
  0x18   : > { %734 = vmatprep.subr.bf16.mxu1 %v733_v36 }
  0x19   : > { %704 = vmatpush3.bf16.msra.mxu0 %v701_v27 }
  0x1a   : > { %706 = vmatprep.subr.bf16.mxu0 %v705_v33 }
  0x1b   : > { %736 = vmatpush3.bf16.msra.mxu1 %v733_v36 }
  0x1c   : > { %738 = vmatprep.subr.bf16.mxu1 %v737_v42 }
  0x1d   : > { %708 = vmatpush3.bf16.msra.mxu0 %v705_v33 }
  0x1e   : > { %710 = vmatprep.subr.bf16.mxu0 %v709_v39 }
  0x1f   : > { %740 = vmatpush3.bf16.msra.mxu1 %v737_v42 }
  0x20   : > { %742 = vmatprep.subr.bf16.mxu1 %v741_v46 }
  0x21   : > { %712 = vmatpush3.bf16.msra.mxu0 %v709_v39 }
  0x22   : > { %714 = vmatprep.subr.bf16.mxu0 %v713_v45 }
  0x23   : > { %744 = vmatpush3.bf16.msra.mxu1 %v741_v46 }
  0x24   : > { %746 = vmatprep.subr.bf16.mxu1 %v745_v55 }
  0x25   : > { %716 = vmatpush3.bf16.msra.mxu0 %v713_v45 }
  0x27   : > { %748 = vmatpush3.bf16.msra.mxu1 %v745_v55 }
  0x28   : > { %642 = vmatmul.mubr.f32.vlgmr.msra.gmra.mrb[0].mxu0 %v233_v49 }
  0x29   : > { %644 = vmatprep.mubr.f32.mxu0 %v234_v50 }
  0x2c   : > { %645 = vmatmul.mubr.f32.gmra.mrb[2].mxu0 %v235_v52 }
  0xfb   : > { %v643_v57 = vpop.f32.mrb[0].mxu0 }
  0xfc   : > { %v331_v58 = vadd.f32 %v643_v57, %v565_v56  ;;  %v325_v59 = vpop.f32.mrb[1].mxu0 }
  0xfd   : > { %v326_v60 = vadd.f32 %v565_v56, %v325_v59 }
  0xfe   : > { %v345_v63 = vmax.f32 %v331_v58, 0.0 }
  0xff   : > { %v646_v61 = vpop.f32.mrb[2].mxu0  ;;  %v344_v62 = vmax.f32 %v326_v60, 0.0 }
 0x100   : > { %v341_v0 = vadd.f32 %v646_v61, %v565_v56  ;;  %v335_v1 = vpop.f32.mrb[3].mxu0 }
 0x101   : > { %v336_v2 = vadd.f32 %v565_v56, %v335_v1  ;;  %679 = vmatprep.mubr.f32.mxu1 %v344_v62 }
 0x102   : > { %680 = vmatmul.mubr.f32.vlgmr.msra.gmra.mrb[0].mxu1 %v345_v63  ;;  %v347_v4 = vmax.f32 %v341_v0, 0.0 }
 0x103   : > { %v346_v3 = vmax.f32 %v336_v2, 0.0 }
 0x105   : > { %682 = vmatprep.mubr.f32.mxu1 %v346_v3 }
 0x106   : > { %683 = vmatmul.mubr.f32.gmra.mrb[2].mxu1 %v347_v4 }
 0x1d5   : > { %v681_v6 = vpop.f32.mrb[0].mxu1 }
 0x1d6   : > { %v437_v7 = vpop.f32.mrb[1].mxu1  ;;  %v443_v11 = vadd.f32 %v681_v6, %v566_v5 }
 0x1d7   : > { %v438_v8 = vadd.f32 %v566_v5, %v437_v7 }
 0x1d9   : > { %v684_v9 = vpop.f32.mrb[2].mxu1  ;;  %456 = vmax.xlane.f32.xlu0 %v438_v8 }
 0x1da   : > { %v447_v10 = vpop.f32.mrb[3].mxu1  ;;  %v453_v13 = vadd.f32 %v684_v9, %v566_v5 }
 0x1db   : > { %v448_v12 = vadd.f32 %v566_v5, %v447_v10 }
 0x1dd   : > { %460 = vmax.xlane.f32.xlu1 %v448_v12  ;;  %458 = vmax.xlane.f32.xlu0 %v443_v11 }
 0x1e1   : > { %462 = vmax.xlane.f32.xlu1 %v453_v13 }
 0x266   : > { %v457_v14 = vpop.xlane.xlu0 %456 }
 0x267   : > { %v464_v15 = vsub.f32 %v438_v8, %v457_v14 }
 0x269   : > { %v468_v16 = vmul.f32 1.442695, %v464_v15 }
 0x26a   : > { %v461_v17 = vpop.xlane.xlu1 %460  ;;  %v459_v18 = vpop.xlane.xlu0 %458 }
 0x26b   : > { %757 = vpow2.f32 %v468_v16  ;;  %v466_v19 = vsub.f32 %v448_v12, %v461_v17  ;;  %v465_v20 = vsub.f32 %v443_v11, %v459_v18 }
 0x26d   : > { %v472_v21 = vmul.f32 1.442695, %v466_v19  ;;  %v470_v22 = vmul.f32 1.442695, %v465_v20 }
 0x26e   : > { %v463_v23 = vpop.xlane.xlu1 %462 }
 0x26f   : > { %759 = vpow2.f32 %v472_v21  ;;  %v467_v24 = vsub.f32 %v453_v13, %v463_v23 }
 0x270   : > { %761 = vpow2.f32 %v470_v22 }
 0x271   : > { %v474_v25 = vmul.f32 1.442695, %v467_v24 }
 0x273   : > { %763 = vpow2.f32 %v474_v25 }
 0x275   : > { %v758_v26 = vpop.eup %757 }
 0x276   : > { %476 = vadd.xlane.f32.xlu0 %v758_v26 }
 0x279   : > { %v760_v27 = vpop.eup %759 }
 0x27a   : > { %v762_v28 = vpop.eup %761  ;;  %480 = vadd.xlane.f32.xlu0 %v760_v27 }
 0x27b   : > { %478 = vadd.xlane.f32.xlu1 %v762_v28 }
 0x27d   : > { %v764_v29 = vpop.eup %763 }
 0x27f   : > { %482 = vadd.xlane.f32.xlu1 %v764_v29 }
 0x303   : > { %v477_v30 = vpop.xlane.xlu0 %476 }
 0x304   : > { %765 = vlog2.f32 %v477_v30 }
 0x307   : > { %v481_v31 = vpop.xlane.xlu0 %480 }
 0x308   : > { %v479_v32 = vpop.xlane.xlu1 %478  ;;  %767 = vlog2.f32 %v481_v31 }
 0x309   : > { %769 = vlog2.f32 %v479_v32 }
 0x30c   : > { %v483_v33 = vpop.xlane.xlu1 %482 }
 0x30d   : > { %771 = vlog2.f32 %v483_v33 }
 0x30e   : > { %v766_v34 = vpop.eup %765 }
 0x30f   : > { %v485_v35 = vmul.f32 0.6931472, %v766_v34 }
 0x311   : > { %v492_v36 = vsub.f32 %v464_v15, %v485_v35 }
 0x312   : > { %v768_v37 = vpop.eup %767 }
 0x313   : > { %v770_v38 = vpop.eup %769  ;;  %496 = vst [vmem:[%s226_s29] sm:$0xff] %v492_v36  ;;  %v489_v39 = vmul.f32 0.6931472, %v768_v37 }
 0x314   : > { %v487_v40 = vmul.f32 0.6931472, %v770_v38 }
 0x315   : > { %v494_v41 = vsub.f32 %v466_v19, %v489_v39 }
 0x316   : > { %v493_v42 = vsub.f32 %v465_v20, %v487_v40 }
 0x317   : > { %v772_v43 = vpop.eup %771  ;;  %498 = vst [vmem:[%s226_s29 + $0x10] sm:$0xff] %v494_v41 }
 0x318   : > { %497 = vst [vmem:[%s226_s29 + $0x8] sm:$0xff] %v493_v42  ;;  %v491_v44 = vmul.f32 0.6931472, %v772_v43 }
 0x31a   : > { %v495_v45 = vsub.f32 %v467_v24, %v491_v44 }
 0x31c   : > { %499 = vst [vmem:[%s226_s29 + $0x18] sm:$0xff] %v495_v45 }
 0x31d PF: > { %s15_s18 = sadd.s32 1, %s779_s18  }
 0x31e   : > { %p12_p4 = scmp.ge.s32.totalorder %s15_s18, 4  }
 0x320   :  { %14 = sbr.rel (!%p12_p4) target bundleno = 1 (0x1), region = 70 }

// kernel: grunet_forward.3
= control target key start
LH: loop header
LB: loop body
LE: loop exit
PB: predicated region body
PF: predicated region fallthrough
CT: control target
= control target key end

     0   :  { %8 = vsyncpa [#allocation3], 0  ;;  %s621_s12 = smov 0   ;;  %s701_s0 = inlined_call_operand.vmem [shape: f32[64,16], index: 0, kind: input, shape index: {}]   ;;  %s702_s1 = inlined_call_operand.hbm [shape: f32[16,384], index: 1, kind: input, shape index: {}]   ;;  %s703_s2 = inlined_call_operand.vmem [shape: f32[1,384], index: 2, kind: input, shape index: {}]   ;;  %s704_s3 = inlined_call_operand.vmem [shape: f32[64,384], index: 3, kind: output, shape index: {}]  }
   0x1 LB: > { %s487_s13 = sadd.s32 4294967295, %s595_s12   ;;  %p489_p0 = scmp.ge.s32.totalorder %s595_s12, 1  ;;  %s595_s12 = sphi %s621_s12, %s14_s12  }
   0x2   : > { %p113_p1 = scmp.lt.s32.totalorder %s595_s12, 3  ;;  %s597_s14 = smov [#allocation2]  }
   0x3   : > { %s125_s15 = sshll.u32 %s597_s14, 4  ;;  %p635_p3 = scmp.eq.s32.totalorder %s487_s13, 0  ;;  %s126_s15 = int_to_ptr.vmem [resolvable:$true] %s125_s15 }
   0x4   : > { %p629_p2 = pnand %p489_p0, %p113_p1  ;;  %s557_s21 = scalar_lea.hbm %s702_s1, 768 }
   0x5   : > { %s709_s17 = scalar_select %p635_p3, 1, 0 }
   0x6   : > { %s708_s16 = scalar_select %p629_p2, 1, 0 }
   0x7   : > { %p539_p4 = pneg %p629_p2  ;;  %p558_p6 = scmp.ne.s32.totalorder %s702_s1, %s557_s21 }
   0x8   : > { %p564_p10 = scmp.lt.u32.totalorder %s557_s21, %s702_s1 }
   0x9   : > { %p643_p5 = pnand %p635_p3, %p539_p4 }
   0xb   : > { %p559_p7 = pneg %p643_p5 }
   0xd   : > { %p560_p8 = pnand %p559_p7, %p558_p6 }
   0xf   : > { %p561_p9 = pneg %p560_p8 }
  0x11   : > { %p566_p11 = pnand %p564_p10, %p561_p9 }
  0x13   : > { %569 = shalt.err (!%p566_p11)
}
  0x14   : > { %s570_s26 = scalar_lea.vmem %s126_s15, 768  ;;  %p578_p1 = scmp.lt.s32.totalorder %s126_s15, %s126_s15 }
  0x15   : > { %p571_p12 = scmp.ne.s32.totalorder %s126_s15, %s570_s26  ;;  %p579_p4 = scmp.lt.s32.totalorder %s570_s26, %s570_s26 }
  0x17   : > { %p573_p13 = pnand %p571_p12, %p559_p7  ;;  %p580_p3 = por %p579_p4, %p578_p1 }
  0x19   : > { %p574_p0 = pneg %p573_p13 }
  0x1b   : > { %p581_p2 = pnand %p580_p3, %p574_p0 }
  0x1d   : > { %584 = shalt.err (!%p581_p2)
}
  0x1e   : > { %s598_s27 = smov 384   ;;  %s599_s28 = smov 24  }
  0x1f   : > { %542 = dma.hbm_to_vmem [thread:$0]  (!%p643_p5), %s702_s1, 768, %s126_s15, [#allocation3], %s598_s27, %s598_s27, %s599_s28  }
  0x20   : > { %p711_p6 = scmp.ne.s32.totalorder %s708_s16, 0 }
  0x21   : > { %p712_p8 = scmp.ne.s32.totalorder (!%p711_p6), %s709_s17, 0 }
  0x22   : > { %153 = sbr.rel (%p711_p6) target bundleno = 273 (0x111), region = 32 }
  0x29   : > { %590 = dma.done.wait (%p712_p8), [#allocation3], 768  }
  0x2a   : > { %592 = vsyncadd (%p712_p8), [#allocation3], 4294966528  ;;  %s494_s4 = sshll.u32 %s487_s13, 2  ;;  %v600_v0 = vmov 0.0   ;;  %v196_v1 = vld [vmem:[#allocation2 + $0x8] sm:$0xff]  ;;  %v199_v2 = vld [vmem:[#allocation2 + $0x20] sm:$0xff]  ;;  %v203_v14 = vlaneseq }
  0x2b   : > { %295 = vmatprep.mubr.f32.mxu0 %v600_v0  ;;  %313 = vmatprep.mubr.f32.mxu1 %v600_v0  ;;  %p179_p2 = scmp.lt.s32.totalorder %s494_s4, 7  ;;  %v195_v3 = vld [vmem:[#allocation2] sm:$0xff]  ;;  %v524_v4 = vpack.c.bf16 %v199_v2, %v196_v1  ;;  %v198_v5 = vld [vmem:[#allocation2 + $0x18] sm:$0xff]  ;;  %v197_v7 = vld [vmem:[#allocation2 + $0x10] sm:$0xff]  ;;  %vm218_vm0 = vcmask 130048  }
  0x2c   : > { %v526_v6 = vpack.c.bf16 %v198_v5, %v195_v3  ;;  %v200_v8 = vld [vmem:[#allocation2 + $0x28] sm:$0xff]  ;;  %v204_v15 = vshrl.u32 %v203_v14, 7  ;;  %v201_v17 = vld [vmem:[%s703_s2] sm:$0x7] }
  0x2d   : > { %s714_s4 = smov (!%p179_p2, %s494_s4), 7  ;;  %525 = vmatprep.subr.bf16.mxu0 %v524_v4  ;;  %532 = vmatprep.subr.bf16.mxu1 %v524_v4  ;;  %v528_v9 = vpack.c.bf16 %v200_v8, %v197_v7 }
  0x2e   : > { %s495_s5 = sshll.u32 %s714_s4, 3  ;;  %527 = vmatpush1.bf16.msra.mxu0 %v526_v6  ;;  %533 = vmatpush1.bf16.msra.mxu1 %v526_v6  ;;  %v205_v16 = vsub.s32 0, %v204_v15  ;;  %v209_v18 = vsub.s32 1, %v204_v15  ;;  %s534_s11 = smul.u32 24, %s714_s4  ;;  %v213_v21 = vsub.s32 2, %v204_v15 }
  0x2f   : > { %s182_s8 = scalar_lea.vmem %s701_s0, %s495_s5  ;;  %529 = vmatprep.subr.bf16.mxu1 %v528_v9 }
  0x30   : > { %v191_v10 = vld [vmem:[%s182_s8] sm:$0xff]  ;;  %v194_v11 = vld [vmem:[%s182_s8 + $0x18] sm:$0xff]  ;;  %v192_v12 = vld [vmem:[%s182_s8 + $0x8] sm:$0xff]  ;;  %v206_v19 = vrot.slane %v201_v17, %v205_v16  ;;  %v210_v20 = vrot.slane %v201_v17, %v209_v18  ;;  %s684_s15 = scalar_lea.vmem %s704_s3, %s534_s11  ;;  %v214_v28 = vrot.slane %v201_v17, %v213_v21 }
  0x31   : > { %498 = vmatmul.mubr.msk.f32.vlgmr.msra.gmra.mrb[0].mxu0 %vm218_vm0, %v191_v10  ;;  %501 = vmatmul.mubr.msk.f32.vlgmr.msra.gmra.mrb[0].mxu1 %vm218_vm0, %v194_v11  ;;  %v193_v13 = vld [vmem:[%s182_s8 + $0x10] sm:$0xff] }
  0x32   : > { %531 = vmatpush3.bf16.msra.mxu1 %v528_v9  ;;  %301 = vmatprep.mubr.f32.mxu0 %v600_v0 }
  0x33   : > { %518 = vmatprep.mubr.msk.f32.mxu1 %vm218_vm0, %v191_v10 }
  0x35   : > { %499 = vmatmul.mubr.msk.f32.gmra.mrb[2].mxu0 %vm218_vm0, %v192_v12  ;;  %519 = vmatmul.mubr.msk.f32.vlgmr.msra.gmra.mrb[2].mxu1 %vm218_vm0, %v192_v12 }
  0x36   : > { %307 = vmatprep.mubr.f32.mxu0 %v600_v0  ;;  %521 = vmatprep.mubr.msk.f32.mxu1 %vm218_vm0, %v193_v13 }
  0x39   : > { %500 = vmatmul.mubr.msk.f32.gmra.mrb[4].mxu0 %vm218_vm0, %v193_v13  ;;  %522 = vmatmul.mubr.msk.f32.gmra.mrb[4].mxu1 %vm218_vm0, %v194_v11 }
 0x104   : > { %v297_v22 = vpop.f32.mrb[0].mxu0  ;;  %v315_v23 = vpop.f32.mrb[0].mxu1 }
 0x105   : > { %v298_v24 = vadd.f32 %v297_v22, %v206_v19  ;;  %v299_v25 = vpop.f32.mrb[1].mxu0  ;;  %v317_v26 = vpop.f32.mrb[1].mxu1  ;;  %v316_v42 = vadd.f32 %v315_v23, %v206_v19 }
 0x106   : > { %v300_v27 = vadd.f32 %v299_v25, %v210_v20  ;;  %v318_v45 = vadd.f32 %v317_v26, %v210_v20 }
 0x107   : > { %405 = vst [vmem:[%s684_s15] sm:$0xff] %v298_v24  ;;  %414 = vst [vmem:[%s684_s15 + $0x48] sm:$0xff] %v316_v42 }
 0x108   : > { %406 = vst [vmem:[%s684_s15 + $0x8] sm:$0xff] %v300_v27  ;;  %v303_v29 = vpop.f32.mrb[2].mxu0  ;;  %v520_v30 = vpop.f32.mrb[2].mxu1  ;;  %415 = vst [vmem:[%s684_s15 + $0x50] sm:$0xff] %v318_v45 }
 0x109   : > { %v304_v31 = vadd.f32 %v303_v29, %v206_v19  ;;  %v305_v32 = vpop.f32.mrb[3].mxu0  ;;  %v386_v33 = vpop.f32.mrb[3].mxu1  ;;  %v392_v36 = vadd.f32 %v520_v30, %v214_v28 }
 0x10a   : > { %v306_v34 = vadd.f32 %v305_v32, %v210_v20  ;;  %v387_v35 = vadd.f32 %v386_v33, %v214_v28 }
 0x10b   : > { %408 = vst [vmem:[%s684_s15 + $0x18] sm:$0xff] %v304_v31  ;;  %410 = vst [vmem:[%s684_s15 + $0x28] sm:$0xff] %v392_v36 }
 0x10c   : > { %409 = vst [vmem:[%s684_s15 + $0x20] sm:$0xff] %v306_v34  ;;  %407 = vst [vmem:[%s684_s15 + $0x10] sm:$0xff] %v387_v35  ;;  %v309_v37 = vpop.f32.mrb[4].mxu0  ;;  %v523_v38 = vpop.f32.mrb[4].mxu1 }
 0x10d   : > { %v310_v39 = vadd.f32 %v309_v37, %v206_v19  ;;  %v311_v40 = vpop.f32.mrb[5].mxu0  ;;  %v396_v41 = vpop.f32.mrb[5].mxu1  ;;  %v402_v46 = vadd.f32 %v523_v38, %v214_v28 }
 0x10e   : > { %v312_v43 = vadd.f32 %v311_v40, %v210_v20  ;;  %v397_v44 = vadd.f32 %v396_v41, %v214_v28 }
 0x10f   : > { %411 = vst [vmem:[%s684_s15 + $0x30] sm:$0xff] %v310_v39  ;;  %416 = vst [vmem:[%s684_s15 + $0x58] sm:$0xff] %v402_v46 }
 0x110   : > { %412 = vst [vmem:[%s684_s15 + $0x38] sm:$0xff] %v312_v43  ;;  %413 = vst [vmem:[%s684_s15 + $0x40] sm:$0xff] %v397_v44 }
 0x111 PF: > { %s14_s12 = sadd.s32 1, %s595_s12  }
 0x112   : > { %p11_p3 = scmp.ge.s32.totalorder %s14_s12, 4  }
 0x114   :  { %13 = sbr.rel (!%p11_p3) target bundleno = 1 (0x1), region = 67 }
 0x11b   :  { %441 = vsyncpa [#allocation3], 1 }
 0x11c   :  { %443 = vsyncpa [#allocation3 + $0x1], 1 }

// kernel: grunet_forward.4
= control target key start
LH: loop header
LB: loop body
LE: loop exit
PB: predicated region body
PF: predicated region fallthrough
CT: control target
= control target key end

     0   :  { %v2426_v3 = vmov 0.0|0.0   ;;  %v2427_v4 = vmov 0.0   ;;  %vm2428_vm0 = vmmov 0   ;;  %s3079_s2 = inlined_call_operand.vmem [shape: f32[128,384], index: 2, kind: input, shape index: {}]   ;;  %s3080_s1 = inlined_call_operand.vmem [shape: f32[8,128], index: 1, kind: input, shape index: {}]   ;;  %s3081_s0 = inlined_call_operand.vmem [shape: f32[8,8,384], index: 0, kind: input, shape index: {}]   ;;  %s3082_s3 = inlined_call_operand.vmem [shape: f32[1,128], index: 3, kind: input, shape index: {}]   ;;  %s3083_s4 = inlined_call_operand.vmem [shape: f32[8,8,128], index: 4, kind: output, shape index: {}]  }
   0x1   :  { %v24_v0 = vld [vmem:[%s3079_s2 + $0x8] sm:$0xff]  ;;  %v27_v1 = vld [vmem:[%s3079_s2 + $0x20] sm:$0xff]  ;;  %1927 = vmatprep.subr.bf16.mxu1 %v2426_v3  ;;  %143 = vmatprep.mubr.f32.mxu0 %v2427_v4  ;;  %v26_v6 = vld [vmem:[%s3079_s2 + $0x18] sm:$0xff] }
   0x2   :  { %v23_v2 = vld [vmem:[%s3079_s2] sm:$0xff]  ;;  %v2465_v5 = vpack.c.bf16 %v27_v1, %v24_v0  ;;  %v30_v7 = vld [vmem:[%s3079_s2 + $0x38] sm:$0xff]  ;;  %v33_v8 = vld [vmem:[%s3079_s2 + $0x50] sm:$0xff]  ;;  %1647 = vmatprep.mubr.msk.f32.mxu1 %vm2428_vm0, %v2427_v4 }
   0x3   :  { %v2478_v9 = vpack.c.bf16 %v26_v6, %v23_v2  ;;  %v2480_v10 = vpack.c.bf16 %v33_v8, %v30_v7  ;;  %v29_v11 = vld [vmem:[%s3079_s2 + $0x30] sm:$0xff]  ;;  %v32_v12 = vld [vmem:[%s3079_s2 + $0x48] sm:$0xff]  ;;  %v39_v14 = vld [vmem:[%s3079_s2 + $0x80] sm:$0xff] }
   0x4   :  { %v36_v13 = vld [vmem:[%s3079_s2 + $0x68] sm:$0xff]  ;;  %1896 = vmatprep.subr.bf16.mxu0 %v2465_v5  ;;  %v2496_v15 = vpack.c.bf16 %v32_v12, %v29_v11  ;;  %v35_v17 = vld [vmem:[%s3079_s2 + $0x60] sm:$0xff]  ;;  %v38_v18 = vld [vmem:[%s3079_s2 + $0x78] sm:$0xff] }
   0x5   :  { %1898 = vmatpush1.bf16.msra.mxu0 %v2478_v9  ;;  %v2499_v16 = vpack.c.bf16 %v39_v14, %v36_v13  ;;  %v42_v19 = vld [vmem:[%s3079_s2 + $0x98] sm:$0xff]  ;;  %v45_v20 = vld [vmem:[%s3079_s2 + $0xb0] sm:$0xff]  ;;  %v2514_v21 = vpack.c.bf16 %v38_v18, %v35_v17  ;;  %v44_v24 = vld [vmem:[%s3079_s2 + $0xa8] sm:$0xff] }
   0x6   :  { %1900 = vmatprep.subr.bf16.mxu0 %v2480_v10  ;;  %v41_v22 = vld [vmem:[%s3079_s2 + $0x90] sm:$0xff]  ;;  %v2520_v23 = vpack.c.bf16 %v45_v20, %v42_v19  ;;  %v28_v26 = vld [vmem:[%s3079_s2 + $0x28] sm:$0xff]  ;;  %v51_v28 = vld [vmem:[%s3079_s2 + $0xe0] sm:$0xff] }
   0x7   :  { %v25_v25 = vld [vmem:[%s3079_s2 + $0x10] sm:$0xff]  ;;  %v48_v27 = vld [vmem:[%s3079_s2 + $0xc8] sm:$0xff]  ;;  %v31_v30 = vld [vmem:[%s3079_s2 + $0x40] sm:$0xff]  ;;  %v2546_v32 = vpack.c.bf16 %v44_v24, %v41_v22 }
   0x8   :  { %v2537_v29 = vpack.c.bf16 %v28_v26, %v25_v25  ;;  %v34_v31 = vld [vmem:[%s3079_s2 + $0x58] sm:$0xff]  ;;  %v47_v33 = vld [vmem:[%s3079_s2 + $0xc0] sm:$0xff]  ;;  %v2555_v35 = vpack.c.bf16 %v51_v28, %v48_v27  ;;  %v37_v37 = vld [vmem:[%s3079_s2 + $0x70] sm:$0xff] }
   0x9   :  { %1902 = vmatpush1.bf16.msra.mxu0 %v2496_v15  ;;  %v2552_v34 = vpack.c.bf16 %v34_v31, %v31_v30  ;;  %v50_v36 = vld [vmem:[%s3079_s2 + $0xd8] sm:$0xff]  ;;  %v40_v38 = vld [vmem:[%s3079_s2 + $0x88] sm:$0xff]  ;;  %v57_v40 = vld [vmem:[%s3079_s2 + $0x110] sm:$0xff] }
   0xa   :  { %1904 = vmatprep.subr.bf16.mxu0 %v2499_v16  ;;  %1929 = vmatpush3.bf16.msra.mxu1 %v2537_v29  ;;  %v54_v39 = vld [vmem:[%s3079_s2 + $0xf8] sm:$0xff]  ;;  %v2574_v41 = vpack.c.bf16 %v50_v36, %v47_v33  ;;  %v53_v42 = vld [vmem:[%s3079_s2 + $0xf0] sm:$0xff]  ;;  %v2580_v43 = vpack.c.bf16 %v40_v38, %v37_v37  ;;  %v56_v45 = vld [vmem:[%s3079_s2 + $0x108] sm:$0xff] }
   0xb   :  { %1930 = vmatprep.subr.bf16.mxu1 %v2426_v3  ;;  %v2583_v44 = vpack.c.bf16 %v57_v40, %v54_v39  ;;  %v43_v46 = vld [vmem:[%s3079_s2 + $0xa0] sm:$0xff]  ;;  %v46_v47 = vld [vmem:[%s3079_s2 + $0xb8] sm:$0xff]  ;;  %v60_v48 = vld [vmem:[%s3079_s2 + $0x128] sm:$0xff]  ;;  %v2602_v50 = vpack.c.bf16 %v56_v45, %v53_v42 }
   0xc   :  { %v63_v49 = vld [vmem:[%s3079_s2 + $0x140] sm:$0xff]  ;;  %v2608_v52 = vpack.c.bf16 %v46_v47, %v43_v46  ;;  %v62_v54 = vld [vmem:[%s3079_s2 + $0x138] sm:$0xff]  ;;  %v49_v55 = vld [vmem:[%s3079_s2 + $0xd0] sm:$0xff] }
   0xd   :  { %1906 = vmatpush1.bf16.msra.mxu0 %v2514_v21  ;;  %v59_v51 = vld [vmem:[%s3079_s2 + $0x120] sm:$0xff]  ;;  %v2611_v53 = vpack.c.bf16 %v63_v49, %v60_v48  ;;  %v52_v56 = vld [vmem:[%s3079_s2 + $0xe8] sm:$0xff]  ;;  %v66_v57 = vld [vmem:[%s3079_s2 + $0x158] sm:$0xff] }
   0xe   :  { %1908 = vmatprep.subr.bf16.mxu0 %v2520_v23  ;;  %1932 = vmatpush3.bf16.msra.mxu1 %v2552_v34  ;;  %v69_v58 = vld [vmem:[%s3079_s2 + $0x170] sm:$0xff]  ;;  %v2630_v59 = vpack.c.bf16 %v62_v54, %v59_v51  ;;  %v2636_v61 = vpack.c.bf16 %v52_v56, %v49_v55  ;;  %v68_v63 = vld [vmem:[%s3079_s2 + $0x168] sm:$0xff]  ;;  %v55_v0 = vld [vmem:[%s3079_s2 + $0x100] sm:$0xff] }
   0xf   :  { %1933 = vmatprep.subr.bf16.mxu1 %v2426_v3  ;;  %v65_v60 = vld [vmem:[%s3079_s2 + $0x150] sm:$0xff]  ;;  %v2639_v62 = vpack.c.bf16 %v69_v58, %v66_v57  ;;  %v58_v1 = vld [vmem:[%s3079_s2 + $0x118] sm:$0xff]  ;;  %v64_v8 = vld [vmem:[%s3079_s2 + $0x148] sm:$0xff] }
  0x10   :  { %v2652_v2 = vpack.c.bf16 %v68_v63, %v65_v60  ;;  %v2655_v6 = vpack.c.bf16 %v58_v1, %v55_v0  ;;  %v61_v7 = vld [vmem:[%s3079_s2 + $0x130] sm:$0xff]  ;;  %v2669_v11 = vld [vmem:[%s3080_s1] sm:$0xff]  ;;  %v70_v14 = vld [vmem:[%s3079_s2 + $0x178] sm:$0xff] }
  0x11   :  { %1910 = vmatpush1.bf16.msra.mxu0 %v2546_v32  ;;  %v2672_v12 = vpack.c.bf16 %v64_v8, %v61_v7  ;;  %v67_v13 = vld [vmem:[%s3079_s2 + $0x160] sm:$0xff]  ;;  %v221_v24 = vld [vmem:[%s3081_s0 + $0x8] sm:$0xff]  ;;  %v222_v42 = vld [vmem:[%s3081_s0 + $0x10] sm:$0xff] }
  0x12   :  { %1912 = vmatprep.subr.bf16.mxu0 %v2555_v35  ;;  %1935 = vmatpush3.bf16.msra.mxu1 %v2580_v43  ;;  %v2684_v17 = vpack.c.bf16 %v70_v14, %v67_v13  ;;  %v220_v18 = vld [vmem:[%s3081_s0] sm:$0xff]  ;;  %v1437_v56 = vld [vmem:[%s3081_s0 + $0x18] sm:$0xff] }
  0x13   :  { %1936 = vmatprep.subr.bf16.mxu1 %v2426_v3  ;;  %v2734_v37 = vld [vmem:[%s3082_s3] ss:$0 sm:$0xff] }
  0x14   :  { %v1438_v0 = vld [vmem:[%s3081_s0 + $0x20] sm:$0xff] }
  0x15   :  { %1914 = vmatpush1.bf16.msra.mxu0 %v2574_v41 }
  0x16   :  { %1916 = vmatprep.subr.bf16.mxu0 %v2583_v44  ;;  %1938 = vmatpush3.bf16.msra.mxu1 %v2608_v52 }
  0x17   :  { %1939 = vmatprep.subr.bf16.mxu1 %v2426_v3 }
  0x19   :  { %1918 = vmatpush1.bf16.msra.mxu0 %v2602_v50 }
  0x1a   :  { %1920 = vmatprep.subr.bf16.mxu0 %v2611_v53  ;;  %1941 = vmatpush3.bf16.msra.mxu1 %v2636_v61 }
  0x1b   :  { %1942 = vmatprep.subr.bf16.mxu1 %v2426_v3 }
  0x1d   :  { %1922 = vmatpush1.bf16.msra.mxu0 %v2630_v59 }
  0x1e   :  { %1924 = vmatprep.subr.bf16.mxu0 %v2639_v62  ;;  %1944 = vmatpush3.bf16.msra.mxu1 %v2655_v6 }
  0x1f   :  { %1945 = vmatprep.subr.bf16.mxu1 %v2426_v3 }
  0x21   :  { %1926 = vmatpush1.bf16.msra.mxu0 %v2652_v2 }
  0x22   :  { %1952 = vmatprep.subr.bf16.mxu0 %v2465_v5  ;;  %1947 = vmatpush3.bf16.msra.mxu1 %v2672_v12 }
  0x23   :  { %1948 = vmatprep.subr.bf16.mxu1 %v2426_v3 }
  0x24   :  { %144 = vmatmul.mubr.f32.vlgmr.msra.gmra.mrb[0].mxu0 %v2669_v11 }
  0x25   :  { %1954 = vmatpush1.bf16.msra.mxu0 %v2478_v9  ;;  %310 = vmatprep.mubr.f32.mxu0 %v2427_v4 }
  0x26   :  { %1956 = vmatprep.subr.bf16.mxu0 %v2480_v10  ;;  %1950 = vmatpush3.bf16.msra.mxu1 %v2684_v17 }
  0x27   :  { %1983 = vmatprep.subr.bf16.mxu1 %v2426_v3 }
  0x29   :  { %1958 = vmatpush1.bf16.msra.mxu0 %v2496_v15  ;;  %1648 = vmatmul.mubr.f32.vlgmr.msra.gmra.mrb[0].mxu1 %v2669_v11 }
  0x2a   :  { %1960 = vmatprep.subr.bf16.mxu0 %v2499_v16  ;;  %1985 = vmatpush3.bf16.msra.mxu1 %v2537_v29 }
  0x2b   :  { %1986 = vmatprep.subr.bf16.mxu1 %v2426_v3  ;;  %1682 = vmatprep.mubr.msk.f32.mxu1 %vm2428_vm0, %v2427_v4 }
  0x2d   :  { %1962 = vmatpush1.bf16.msra.mxu0 %v2514_v21 }
  0x2e   :  { %1964 = vmatprep.subr.bf16.mxu0 %v2520_v23  ;;  %1988 = vmatpush3.bf16.msra.mxu1 %v2552_v34 }
  0x2f   :  { %1989 = vmatprep.subr.bf16.mxu1 %v2426_v3 }
  0x31   :  { %1966 = vmatpush1.bf16.msra.mxu0 %v2546_v32 }
  0x32   :  { %1968 = vmatprep.subr.bf16.mxu0 %v2555_v35  ;;  %1991 = vmatpush3.bf16.msra.mxu1 %v2580_v43 }
  0x33   :  { %1992 = vmatprep.subr.bf16.mxu1 %v2426_v3 }
  0x35   :  { %1970 = vmatpush1.bf16.msra.mxu0 %v2574_v41 }
  0x36   :  { %1972 = vmatprep.subr.bf16.mxu0 %v2583_v44  ;;  %1994 = vmatpush3.bf16.msra.mxu1 %v2608_v52 }
  0x37   :  { %1995 = vmatprep.subr.bf16.mxu1 %v2426_v3 }
  0x39   :  { %1974 = vmatpush1.bf16.msra.mxu0 %v2602_v50 }
  0x3a   :  { %1976 = vmatprep.subr.bf16.mxu0 %v2611_v53  ;;  %1997 = vmatpush3.bf16.msra.mxu1 %v2636_v61 }
  0x3b   :  { %1998 = vmatprep.subr.bf16.mxu1 %v2426_v3 }
  0x3d   :  { %1978 = vmatpush1.bf16.msra.mxu0 %v2630_v59 }
  0x3e   :  { %1980 = vmatprep.subr.bf16.mxu0 %v2639_v62  ;;  %2000 = vmatpush3.bf16.msra.mxu1 %v2655_v6 }
  0x3f   :  { %2001 = vmatprep.subr.bf16.mxu1 %v2426_v3 }
  0x41   :  { %1982 = vmatpush1.bf16.msra.mxu0 %v2652_v2 }
  0x42   :  { %2008 = vmatprep.subr.bf16.mxu0 %v2465_v5  ;;  %2003 = vmatpush3.bf16.msra.mxu1 %v2672_v12 }
  0x43   :  { %2004 = vmatprep.subr.bf16.mxu1 %v2426_v3 }
  0x46   :  { %2006 = vmatpush3.bf16.msra.mxu1 %v2684_v17 }
  0x47   :  { %2039 = vmatprep.subr.bf16.mxu1 %v2426_v3 }
  0xf7   :  { %v145_v19 = vpop.f32.mrb[0].mxu0 }
  0xf8   :  { %v223_v20 = vadd.f32 %v220_v18, %v145_v19  ;;  %v147_v22 = vpop.f32.mrb[1].mxu0 }
  0xf9   :  { %v230_v26 = vadd.f32 %v221_v24, %v147_v22  ;;  %v1439_v24 = vld [vmem:[%s3081_s0 + $0x28] sm:$0xff] }
  0xfa   :  { %v1435_v25 = vmul.f32 -1.442695, %v223_v20 }
  0xfb   :  { %v1436_v27 = vmul.f32 -1.442695, %v230_v26 }
  0xfc   :  { %2346 = vpow2.f32 %v1435_v25  ;;  %v216_v28 = vpop.f32.mrb[0].mxu1 }
  0xfd   :  { %v1649_v30 = vpop.f32.mrb[1].mxu1  ;;  %2348 = vpow2.f32 %v1436_v27  ;;  %v237_v39 = vadd.f32 %v2734_v37, %v216_v28 }
 0x106   :  { %v2347_v31 = vpop.eup %2346 }
 0x107   :  { %v227_v33 = vadd.f32 1.0, %v2347_v31  ;;  %v2349_v36 = vpop.eup %2348 }
 0x108   :  { %v234_v38 = vadd.f32 1.0, %v2349_v36 }
 0x109   :  { %2350 = vrcp.f32 %v227_v33 }
 0x10a   :  { %2352 = vrcp.f32 %v234_v38  ;;  %v1443_v38 = vld [vmem:[%s3081_s0 + $0x30] sm:$0xff] }
 0x113   :  { %v2351_v40 = vpop.eup %2350 }
 0x114   :  { %v238_v45 = vmul.f32 %v2351_v40, %v237_v39  ;;  %v2353_v47 = vpop.eup %2352 }
 0x115   :  { %v241_v48 = vsub.f32 1.0, %v2353_v47  ;;  %v243_v54 = vmul.f32 %v2353_v47, %v2669_v11 }
 0x116   :  { %v239_v46 = vadd.f32 %v238_v45, %v222_v42 }
 0x118   :  { %2354 = vtanh.f32 %v239_v46  ;;  %v1444_v46 = vld [vmem:[%s3081_s0 + $0x38] sm:$0xff] }
 0x122   :  { %v2355_v49 = vpop.eup %2354 }
 0x123   :  { %v242_v51 = vmul.f32 %v2355_v49, %v241_v48 }
 0x125   :  { %v2741_v55 = vadd.f32 %v243_v54, %v242_v51 }
 0x127   :  { %245 = vst [vmem:[%s3083_s4] sm:$0xff] %v2741_v55  ;;  %311 = vmatmul.mubr.f32.vlgmr.msra.gmra.mrb[2].mxu0 %v2741_v55  ;;  %1683 = vmatmul.mubr.f32.vlgmr.msra.gmra.mrb[2].mxu1 %v2741_v55 }
 0x128   :  { %2010 = vmatpush1.bf16.msra.mxu0 %v2478_v9  ;;  %2041 = vmatpush3.bf16.msra.mxu1 %v2537_v29 }
 0x129   :  { %2012 = vmatprep.subr.bf16.mxu0 %v2480_v10  ;;  %2042 = vmatprep.subr.bf16.mxu1 %v2426_v3 }
 0x12a   :  { %479 = vmatprep.mubr.f32.mxu0 %v2427_v4  ;;  %1717 = vmatprep.mubr.msk.f32.mxu1 %vm2428_vm0, %v2427_v4 }
 0x12c   :  { %2014 = vmatpush1.bf16.msra.mxu0 %v2496_v15  ;;  %2044 = vmatpush3.bf16.msra.mxu1 %v2552_v34 }
 0x12d   :  { %2016 = vmatprep.subr.bf16.mxu0 %v2499_v16  ;;  %2045 = vmatprep.subr.bf16.mxu1 %v2426_v3 }
 0x130   :  { %2018 = vmatpush1.bf16.msra.mxu0 %v2514_v21  ;;  %2047 = vmatpush3.bf16.msra.mxu1 %v2580_v43 }
 0x131   :  { %2020 = vmatprep.subr.bf16.mxu0 %v2520_v23  ;;  %2048 = vmatprep.subr.bf16.mxu1 %v2426_v3 }
 0x134   :  { %2022 = vmatpush1.bf16.msra.mxu0 %v2546_v32  ;;  %2050 = vmatpush3.bf16.msra.mxu1 %v2608_v52 }
 0x135   :  { %2024 = vmatprep.subr.bf16.mxu0 %v2555_v35  ;;  %2051 = vmatprep.subr.bf16.mxu1 %v2426_v3 }
 0x138   :  { %2026 = vmatpush1.bf16.msra.mxu0 %v2574_v41  ;;  %2053 = vmatpush3.bf16.msra.mxu1 %v2636_v61 }
 0x139   :  { %2028 = vmatprep.subr.bf16.mxu0 %v2583_v44  ;;  %2054 = vmatprep.subr.bf16.mxu1 %v2426_v3 }
 0x13c   :  { %2030 = vmatpush1.bf16.msra.mxu0 %v2602_v50  ;;  %2056 = vmatpush3.bf16.msra.mxu1 %v2655_v6 }
 0x13d   :  { %2032 = vmatprep.subr.bf16.mxu0 %v2611_v53  ;;  %2057 = vmatprep.subr.bf16.mxu1 %v2426_v3 }
 0x140   :  { %2034 = vmatpush1.bf16.msra.mxu0 %v2630_v59  ;;  %2059 = vmatpush3.bf16.msra.mxu1 %v2672_v12 }
 0x141   :  { %2036 = vmatprep.subr.bf16.mxu0 %v2639_v62  ;;  %2060 = vmatprep.subr.bf16.mxu1 %v2426_v3 }
 0x144   :  { %2038 = vmatpush1.bf16.msra.mxu0 %v2652_v2  ;;  %2062 = vmatpush3.bf16.msra.mxu1 %v2684_v17 }
 0x145   :  { %2064 = vmatprep.subr.bf16.mxu0 %v2465_v5  ;;  %2095 = vmatprep.subr.bf16.mxu1 %v2426_v3 }
 0x1fa   :  { %v312_v57 = vpop.f32.mrb[2].mxu0  ;;  %v383_v58 = vpop.f32.mrb[2].mxu1 }
 0x1fb   :  { %v391_v60 = vadd.f32 %v1437_v56, %v312_v57  ;;  %v314_v63 = vpop.f32.mrb[3].mxu0  ;;  %v1684_v1 = vpop.f32.mrb[3].mxu1  ;;  %v405_v20 = vadd.f32 %v2734_v37, %v383_v58 }
 0x1fc   :  { %v398_v8 = vadd.f32 %v1438_v0, %v314_v63  ;;  %v1445_v63 = vld [vmem:[%s3081_s0 + $0x40] sm:$0xff] }
 0x1fd   :  { %v1440_v7 = vmul.f32 -1.442695, %v391_v60 }
 0x1fe   :  { %v1441_v11 = vmul.f32 -1.442695, %v398_v8 }
 0x1ff   :  { %2356 = vpow2.f32 %v1440_v7 }
 0x200   :  { %2358 = vpow2.f32 %v1441_v11 }
 0x209   :  { %v2357_v13 = vpop.eup %2356 }
 0x20a   :  { %v395_v14 = vadd.f32 1.0, %v2357_v13  ;;  %v2359_v18 = vpop.eup %2358 }
 0x20b   :  { %v402_v19 = vadd.f32 1.0, %v2359_v18 }
 0x20c   :  { %2360 = vrcp.f32 %v395_v14 }
 0x20d   :  { %2362 = vrcp.f32 %v402_v19  ;;  %v1449_v19 = vld [vmem:[%s3081_s0 + $0x48] sm:$0xff] }
 0x216   :  { %v2361_v22 = vpop.eup %2360 }
 0x217   :  { %v406_v25 = vmul.f32 %v2361_v22, %v405_v20  ;;  %v2363_v27 = vpop.eup %2362 }
 0x218   :  { %v409_v28 = vsub.f32 1.0, %v2363_v27  ;;  %v411_v33 = vmul.f32 %v2363_v27, %v2741_v55 }
 0x219   :  { %v407_v26 = vadd.f32 %v1439_v24, %v406_v25 }
 0x21b   :  { %2364 = vtanh.f32 %v407_v26  ;;  %v1450_v26 = vld [vmem:[%s3081_s0 + $0x50] sm:$0xff] }
 0x225   :  { %v2365_v30 = vpop.eup %2364 }
 0x226   :  { %v410_v31 = vmul.f32 %v2365_v30, %v409_v28 }
 0x228   :  { %v2795_v36 = vadd.f32 %v411_v33, %v410_v31 }
 0x22a   :  { %1442 = vst [vmem:[%s3083_s4 + $0x8] sm:$0xff] %v2795_v36  ;;  %480 = vmatmul.mubr.f32.vlgmr.msra.gmra.mrb[4].mxu0 %v2795_v36  ;;  %1718 = vmatmul.mubr.f32.vlgmr.msra.gmra.mrb[4].mxu1 %v2795_v36 }
 0x22b   :  { %2066 = vmatpush1.bf16.msra.mxu0 %v2478_v9  ;;  %2097 = vmatpush3.bf16.msra.mxu1 %v2537_v29 }
 0x22c   :  { %2068 = vmatprep.subr.bf16.mxu0 %v2480_v10  ;;  %2098 = vmatprep.subr.bf16.mxu1 %v2426_v3 }
 0x22d   :  { %648 = vmatprep.mubr.f32.mxu0 %v2427_v4  ;;  %1752 = vmatprep.mubr.msk.f32.mxu1 %vm2428_vm0, %v2427_v4 }
 0x22f   :  { %2070 = vmatpush1.bf16.msra.mxu0 %v2496_v15  ;;  %2100 = vmatpush3.bf16.msra.mxu1 %v2552_v34 }
 0x230   :  { %2072 = vmatprep.subr.bf16.mxu0 %v2499_v16  ;;  %2101 = vmatprep.subr.bf16.mxu1 %v2426_v3 }
 0x233   :  { %2074 = vmatpush1.bf16.msra.mxu0 %v2514_v21  ;;  %2103 = vmatpush3.bf16.msra.mxu1 %v2580_v43 }
 0x234   :  { %2076 = vmatprep.subr.bf16.mxu0 %v2520_v23  ;;  %2104 = vmatprep.subr.bf16.mxu1 %v2426_v3 }
 0x237   :  { %2078 = vmatpush1.bf16.msra.mxu0 %v2546_v32  ;;  %2106 = vmatpush3.bf16.msra.mxu1 %v2608_v52 }
 0x238   :  { %2080 = vmatprep.subr.bf16.mxu0 %v2555_v35  ;;  %2107 = vmatprep.subr.bf16.mxu1 %v2426_v3 }
 0x23b   :  { %2082 = vmatpush1.bf16.msra.mxu0 %v2574_v41  ;;  %2109 = vmatpush3.bf16.msra.mxu1 %v2636_v61 }
 0x23c   :  { %2084 = vmatprep.subr.bf16.mxu0 %v2583_v44  ;;  %2110 = vmatprep.subr.bf16.mxu1 %v2426_v3 }
 0x23f   :  { %2086 = vmatpush1.bf16.msra.mxu0 %v2602_v50  ;;  %2112 = vmatpush3.bf16.msra.mxu1 %v2655_v6 }
 0x240   :  { %2088 = vmatprep.subr.bf16.mxu0 %v2611_v53  ;;  %2113 = vmatprep.subr.bf16.mxu1 %v2426_v3 }
 0x243   :  { %2090 = vmatpush1.bf16.msra.mxu0 %v2630_v59  ;;  %2115 = vmatpush3.bf16.msra.mxu1 %v2672_v12 }
 0x244   :  { %2092 = vmatprep.subr.bf16.mxu0 %v2639_v62  ;;  %2116 = vmatprep.subr.bf16.mxu1 %v2426_v3 }
 0x247   :  { %2094 = vmatpush1.bf16.msra.mxu0 %v2652_v2  ;;  %2118 = vmatpush3.bf16.msra.mxu1 %v2684_v17 }
 0x248   :  { %2120 = vmatprep.subr.bf16.mxu0 %v2465_v5  ;;  %2151 = vmatprep.subr.bf16.mxu1 %v2426_v3 }
 0x2fd   :  { %v481_v39 = vpop.f32.mrb[4].mxu0  ;;  %v552_v40 = vpop.f32.mrb[4].mxu1 }
 0x2fe   :  { %v560_v42 = vadd.f32 %v1443_v38, %v481_v39  ;;  %v483_v45 = vpop.f32.mrb[5].mxu0  ;;  %v1719_v47 = vpop.f32.mrb[5].mxu1  ;;  %v574_v58 = vadd.f32 %v2734_v37, %v552_v40 }
 0x2ff   :  { %v567_v49 = vadd.f32 %v1444_v46, %v483_v45  ;;  %v1451_v45 = vld [vmem:[%s3081_s0 + $0x58] sm:$0xff] }
 0x300   :  { %v1446_v48 = vmul.f32 -1.442695, %v560_v42 }
 0x301   :  { %v1447_v51 = vmul.f32 -1.442695, %v567_v49 }
 0x302   :  { %2366 = vpow2.f32 %v1446_v48 }
 0x303   :  { %2368 = vpow2.f32 %v1447_v51 }
 0x30c   :  { %v2367_v54 = vpop.eup %2366 }
 0x30d   :  { %v564_v55 = vadd.f32 1.0, %v2367_v54  ;;  %v2369_v56 = vpop.eup %2368 }
 0x30e   :  { %v571_v57 = vadd.f32 1.0, %v2369_v56 }
 0x30f   :  { %2370 = vrcp.f32 %v564_v55 }
 0x310   :  { %2372 = vrcp.f32 %v571_v57  ;;  %v1455_v57 = vld [vmem:[%s3081_s0 + $0x60] sm:$0xff] }
 0x319   :  { %v2371_v60 = vpop.eup %2370 }
 0x31a   :  { %v575_v0 = vmul.f32 %v2371_v60, %v574_v58  ;;  %v2373_v7 = vpop.eup %2372 }
 0x31b   :  { %v578_v8 = vsub.f32 1.0, %v2373_v7  ;;  %v580_v14 = vmul.f32 %v2373_v7, %v2795_v36 }
 0x31c   :  { %v576_v1 = vadd.f32 %v1445_v63, %v575_v0 }
 0x31e   :  { %2374 = vtanh.f32 %v576_v1  ;;  %v1456_v1 = vld [vmem:[%s3081_s0 + $0x68] sm:$0xff] }
 0x328   :  { %v2375_v11 = vpop.eup %2374 }
 0x329   :  { %v579_v13 = vmul.f32 %v2375_v11, %v578_v8 }
 0x32b   :  { %v2849_v18 = vadd.f32 %v580_v14, %v579_v13 }
 0x32d   :  { %1448 = vst [vmem:[%s3083_s4 + $0x10] sm:$0xff] %v2849_v18  ;;  %649 = vmatmul.mubr.f32.vlgmr.msra.gmra.mrb[6].mxu0 %v2849_v18  ;;  %1753 = vmatmul.mubr.f32.vlgmr.msra.gmra.mrb[6].mxu1 %v2849_v18 }
 0x32e   :  { %2122 = vmatpush1.bf16.msra.mxu0 %v2478_v9  ;;  %2153 = vmatpush3.bf16.msra.mxu1 %v2537_v29 }
 0x32f   :  { %2124 = vmatprep.subr.bf16.mxu0 %v2480_v10  ;;  %2154 = vmatprep.subr.bf16.mxu1 %v2426_v3 }
 0x330   :  { %817 = vmatprep.mubr.f32.mxu0 %v2427_v4  ;;  %1787 = vmatprep.mubr.msk.f32.mxu1 %vm2428_vm0, %v2427_v4 }
 0x332   :  { %2126 = vmatpush1.bf16.msra.mxu0 %v2496_v15  ;;  %2156 = vmatpush3.bf16.msra.mxu1 %v2552_v34 }
 0x333   :  { %2128 = vmatprep.subr.bf16.mxu0 %v2499_v16  ;;  %2157 = vmatprep.subr.bf16.mxu1 %v2426_v3 }
 0x336   :  { %2130 = vmatpush1.bf16.msra.mxu0 %v2514_v21  ;;  %2159 = vmatpush3.bf16.msra.mxu1 %v2580_v43 }
 0x337   :  { %2132 = vmatprep.subr.bf16.mxu0 %v2520_v23  ;;  %2160 = vmatprep.subr.bf16.mxu1 %v2426_v3 }
 0x33a   :  { %2134 = vmatpush1.bf16.msra.mxu0 %v2546_v32  ;;  %2162 = vmatpush3.bf16.msra.mxu1 %v2608_v52 }
 0x33b   :  { %2136 = vmatprep.subr.bf16.mxu0 %v2555_v35  ;;  %2163 = vmatprep.subr.bf16.mxu1 %v2426_v3 }
 0x33e   :  { %2138 = vmatpush1.bf16.msra.mxu0 %v2574_v41  ;;  %2165 = vmatpush3.bf16.msra.mxu1 %v2636_v61 }
 0x33f   :  { %2140 = vmatprep.subr.bf16.mxu0 %v2583_v44  ;;  %2166 = vmatprep.subr.bf16.mxu1 %v2426_v3 }
 0x342   :  { %2142 = vmatpush1.bf16.msra.mxu0 %v2602_v50  ;;  %2168 = vmatpush3.bf16.msra.mxu1 %v2655_v6 }
 0x343   :  { %2144 = vmatprep.subr.bf16.mxu0 %v2611_v53  ;;  %2169 = vmatprep.subr.bf16.mxu1 %v2426_v3 }
 0x346   :  { %2146 = vmatpush1.bf16.msra.mxu0 %v2630_v59  ;;  %2171 = vmatpush3.bf16.msra.mxu1 %v2672_v12 }
 0x347   :  { %2148 = vmatprep.subr.bf16.mxu0 %v2639_v62  ;;  %2172 = vmatprep.subr.bf16.mxu1 %v2426_v3 }
 0x34a   :  { %2150 = vmatpush1.bf16.msra.mxu0 %v2652_v2  ;;  %2174 = vmatpush3.bf16.msra.mxu1 %v2684_v17 }
 0x34b   :  { %2176 = vmatprep.subr.bf16.mxu0 %v2465_v5  ;;  %2207 = vmatprep.subr.bf16.mxu1 %v2426_v3 }
 0x400   :  { %v650_v20 = vpop.f32.mrb[6].mxu0  ;;  %v721_v22 = vpop.f32.mrb[6].mxu1 }
 0x401   :  { %v729_v24 = vadd.f32 %v1449_v19, %v650_v20  ;;  %v652_v25 = vpop.f32.mrb[7].mxu0  ;;  %v1754_v27 = vpop.f32.mrb[7].mxu1  ;;  %v743_v40 = vadd.f32 %v2734_v37, %v721_v22 }
 0x402   :  { %v736_v30 = vadd.f32 %v1450_v26, %v652_v25  ;;  %v1457_v25 = vld [vmem:[%s3081_s0 + $0x70] sm:$0xff] }
 0x403   :  { %v1452_v28 = vmul.f32 -1.442695, %v729_v24 }
 0x404   :  { %v1453_v31 = vmul.f32 -1.442695, %v736_v30 }
 0x405   :  { %2376 = vpow2.f32 %v1452_v28 }
 0x406   :  { %2378 = vpow2.f32 %v1453_v31 }
 0x40f   :  { %v2377_v33 = vpop.eup %2376 }
 0x410   :  { %v733_v36 = vadd.f32 1.0, %v2377_v33  ;;  %v2379_v38 = vpop.eup %2378 }
 0x411   :  { %v740_v39 = vadd.f32 1.0, %v2379_v38 }
 0x412   :  { %2380 = vrcp.f32 %v733_v36 }
 0x413   :  { %2382 = vrcp.f32 %v740_v39  ;;  %v1461_v39 = vld [vmem:[%s3081_s0 + $0x78] sm:$0xff] }
 0x41c   :  { %v2381_v42 = vpop.eup %2380 }
 0x41d   :  { %v744_v46 = vmul.f32 %v2381_v42, %v743_v40  ;;  %v2383_v48 = vpop.eup %2382 }
 0x41e   :  { %v747_v49 = vsub.f32 1.0, %v2383_v48  ;;  %v749_v55 = vmul.f32 %v2383_v48, %v2849_v18 }
 0x41f   :  { %v745_v47 = vadd.f32 %v1451_v45, %v744_v46 }
 0x421   :  { %2384 = vtanh.f32 %v745_v47  ;;  %v1462_v47 = vld [vmem:[%s3081_s0 + $0x80] sm:$0xff] }
 0x42b   :  { %v2385_v51 = vpop.eup %2384 }
 0x42c   :  { %v748_v54 = vmul.f32 %v2385_v51, %v747_v49 }
 0x42e   :  { %v2903_v56 = vadd.f32 %v749_v55, %v748_v54 }
 0x430   :  { %1454 = vst [vmem:[%s3083_s4 + $0x18] sm:$0xff] %v2903_v56  ;;  %818 = vmatmul.mubr.f32.vlgmr.msra.gmra.mrb[8].mxu0 %v2903_v56  ;;  %1788 = vmatmul.mubr.f32.vlgmr.msra.gmra.mrb[8].mxu1 %v2903_v56 }
 0x431   :  { %2178 = vmatpush1.bf16.msra.mxu0 %v2478_v9  ;;  %2209 = vmatpush3.bf16.msra.mxu1 %v2537_v29 }
 0x432   :  { %2180 = vmatprep.subr.bf16.mxu0 %v2480_v10  ;;  %2210 = vmatprep.subr.bf16.mxu1 %v2426_v3 }
 0x433   :  { %986 = vmatprep.mubr.f32.mxu0 %v2427_v4  ;;  %1822 = vmatprep.mubr.msk.f32.mxu1 %vm2428_vm0, %v2427_v4 }
 0x435   :  { %2182 = vmatpush1.bf16.msra.mxu0 %v2496_v15  ;;  %2212 = vmatpush3.bf16.msra.mxu1 %v2552_v34 }
 0x436   :  { %2184 = vmatprep.subr.bf16.mxu0 %v2499_v16  ;;  %2213 = vmatprep.subr.bf16.mxu1 %v2426_v3 }
 0x439   :  { %2186 = vmatpush1.bf16.msra.mxu0 %v2514_v21  ;;  %2215 = vmatpush3.bf16.msra.mxu1 %v2580_v43 }
 0x43a   :  { %2188 = vmatprep.subr.bf16.mxu0 %v2520_v23  ;;  %2216 = vmatprep.subr.bf16.mxu1 %v2426_v3 }
 0x43d   :  { %2190 = vmatpush1.bf16.msra.mxu0 %v2546_v32  ;;  %2218 = vmatpush3.bf16.msra.mxu1 %v2608_v52 }
 0x43e   :  { %2192 = vmatprep.subr.bf16.mxu0 %v2555_v35  ;;  %2219 = vmatprep.subr.bf16.mxu1 %v2426_v3 }
 0x441   :  { %2194 = vmatpush1.bf16.msra.mxu0 %v2574_v41  ;;  %2221 = vmatpush3.bf16.msra.mxu1 %v2636_v61 }
 0x442   :  { %2196 = vmatprep.subr.bf16.mxu0 %v2583_v44  ;;  %2222 = vmatprep.subr.bf16.mxu1 %v2426_v3 }
 0x445   :  { %2198 = vmatpush1.bf16.msra.mxu0 %v2602_v50  ;;  %2224 = vmatpush3.bf16.msra.mxu1 %v2655_v6 }
 0x446   :  { %2200 = vmatprep.subr.bf16.mxu0 %v2611_v53  ;;  %2225 = vmatprep.subr.bf16.mxu1 %v2426_v3 }
 0x449   :  { %2202 = vmatpush1.bf16.msra.mxu0 %v2630_v59  ;;  %2227 = vmatpush3.bf16.msra.mxu1 %v2672_v12 }
 0x44a   :  { %2204 = vmatprep.subr.bf16.mxu0 %v2639_v62  ;;  %2228 = vmatprep.subr.bf16.mxu1 %v2426_v3 }
 0x44d   :  { %2206 = vmatpush1.bf16.msra.mxu0 %v2652_v2  ;;  %2230 = vmatpush3.bf16.msra.mxu1 %v2684_v17 }
 0x44e   :  { %2232 = vmatprep.subr.bf16.mxu0 %v2465_v5  ;;  %2263 = vmatprep.subr.bf16.mxu1 %v2426_v3 }
 0x503   :  { %v819_v58 = vpop.f32.mrb[8].mxu0  ;;  %v890_v60 = vpop.f32.mrb[8].mxu1 }
 0x504   :  { %v898_v63 = vadd.f32 %v1455_v57, %v819_v58  ;;  %v821_v0 = vpop.f32.mrb[9].mxu0  ;;  %v1789_v7 = vpop.f32.mrb[9].mxu1  ;;  %v912_v22 = vadd.f32 %v2734_v37, %v890_v60 }
 0x505   :  { %v905_v11 = vadd.f32 %v1456_v1, %v821_v0 }
 0x506   :  { %v1458_v8 = vmul.f32 -1.442695, %v898_v63  ;;  %v1463_v63 = vld [vmem:[%s3081_s0 + $0x88] sm:$0xff] }
 0x507   :  { %v1459_v13 = vmul.f32 -1.442695, %v905_v11 }
 0x508   :  { %2386 = vpow2.f32 %v1458_v8 }
 0x509   :  { %2388 = vpow2.f32 %v1459_v13 }
 0x512   :  { %v2387_v14 = vpop.eup %2386 }
 0x513   :  { %v902_v18 = vadd.f32 1.0, %v2387_v14  ;;  %v2389_v19 = vpop.eup %2388 }
 0x514   :  { %v909_v20 = vadd.f32 1.0, %v2389_v19  ;;  %v1473_v19 = vld [vmem:[%s3081_s0 + $0xa8] sm:$0xff] }
 0x515   :  { %2390 = vrcp.f32 %v902_v18 }
 0x516   :  { %2392 = vrcp.f32 %v909_v20 }
 0x51f   :  { %v2391_v24 = vpop.eup %2390 }
 0x520   :  { %v913_v26 = vmul.f32 %v2391_v24, %v912_v22  ;;  %v2393_v28 = vpop.eup %2392 }
 0x521   :  { %v916_v30 = vsub.f32 1.0, %v2393_v28  ;;  %v918_v36 = vmul.f32 %v2393_v28, %v2903_v56 }
 0x522   :  { %v914_v27 = vadd.f32 %v1457_v25, %v913_v26  ;;  %v1474_v26 = vld [vmem:[%s3081_s0 + $0xb0] sm:$0xff] }
 0x524   :  { %2394 = vtanh.f32 %v914_v27 }
 0x52e   :  { %v2395_v31 = vpop.eup %2394 }
 0x52f   :  { %v917_v33 = vmul.f32 %v2395_v31, %v916_v30 }
 0x531   :  { %v2957_v38 = vadd.f32 %v918_v36, %v917_v33 }
 0x533   :  { %1460 = vst [vmem:[%s3083_s4 + $0x20] sm:$0xff] %v2957_v38  ;;  %987 = vmatmul.mubr.f32.vlgmr.msra.gmra.mrb[10].mxu0 %v2957_v38  ;;  %1823 = vmatmul.mubr.f32.vlgmr.msra.gmra.mrb[10].mxu1 %v2957_v38 }
 0x534   :  { %2234 = vmatpush1.bf16.msra.mxu0 %v2478_v9  ;;  %2265 = vmatpush3.bf16.msra.mxu1 %v2537_v29 }
 0x535   :  { %2236 = vmatprep.subr.bf16.mxu0 %v2480_v10  ;;  %2266 = vmatprep.subr.bf16.mxu1 %v2426_v3 }
 0x536   :  { %1155 = vmatprep.mubr.f32.mxu0 %v2427_v4  ;;  %1857 = vmatprep.mubr.msk.f32.mxu1 %vm2428_vm0, %v2427_v4 }
 0x538   :  { %2238 = vmatpush1.bf16.msra.mxu0 %v2496_v15  ;;  %2268 = vmatpush3.bf16.msra.mxu1 %v2552_v34 }
 0x539   :  { %2240 = vmatprep.subr.bf16.mxu0 %v2499_v16  ;;  %2269 = vmatprep.subr.bf16.mxu1 %v2426_v3 }
 0x53c   :  { %2242 = vmatpush1.bf16.msra.mxu0 %v2514_v21  ;;  %2271 = vmatpush3.bf16.msra.mxu1 %v2580_v43 }
 0x53d   :  { %2244 = vmatprep.subr.bf16.mxu0 %v2520_v23  ;;  %2272 = vmatprep.subr.bf16.mxu1 %v2426_v3 }
 0x540   :  { %2246 = vmatpush1.bf16.msra.mxu0 %v2546_v32  ;;  %2274 = vmatpush3.bf16.msra.mxu1 %v2608_v52 }
 0x541   :  { %2248 = vmatprep.subr.bf16.mxu0 %v2555_v35  ;;  %2275 = vmatprep.subr.bf16.mxu1 %v2426_v3 }
 0x544   :  { %2250 = vmatpush1.bf16.msra.mxu0 %v2574_v41  ;;  %2277 = vmatpush3.bf16.msra.mxu1 %v2636_v61 }
 0x545   :  { %2252 = vmatprep.subr.bf16.mxu0 %v2583_v44  ;;  %2278 = vmatprep.subr.bf16.mxu1 %v2426_v3 }
 0x548   :  { %2254 = vmatpush1.bf16.msra.mxu0 %v2602_v50  ;;  %2280 = vmatpush3.bf16.msra.mxu1 %v2655_v6 }
 0x549   :  { %2256 = vmatprep.subr.bf16.mxu0 %v2611_v53  ;;  %2281 = vmatprep.subr.bf16.mxu1 %v2426_v3 }
 0x54c   :  { %2258 = vmatpush1.bf16.msra.mxu0 %v2630_v59  ;;  %2283 = vmatpush3.bf16.msra.mxu1 %v2672_v12 }
 0x54d   :  { %2260 = vmatprep.subr.bf16.mxu0 %v2639_v62  ;;  %2284 = vmatprep.subr.bf16.mxu1 %v2426_v3 }
 0x550   :  { %2262 = vmatpush1.bf16.msra.mxu0 %v2652_v2  ;;  %2286 = vmatpush3.bf16.msra.mxu1 %v2684_v17 }
 0x551   :  { %2288 = vmatprep.subr.bf16.mxu0 %v2465_v5  ;;  %2319 = vmatprep.subr.bf16.mxu1 %v2426_v3 }
 0x606   :  { %v988_v40 = vpop.f32.mrb[10].mxu0  ;;  %v1059_v42 = vpop.f32.mrb[10].mxu1 }
 0x607   :  { %v1067_v45 = vadd.f32 %v1461_v39, %v988_v40  ;;  %v990_v46 = vpop.f32.mrb[11].mxu0  ;;  %v1824_v48 = vpop.f32.mrb[11].mxu1  ;;  %v1081_v58 = vadd.f32 %v2734_v37, %v1059_v42 }
 0x608   :  { %v1074_v51 = vadd.f32 %v1462_v47, %v990_v46 }
 0x609   :  { %v1464_v49 = vmul.f32 -1.442695, %v1067_v45  ;;  %v1475_v45 = vld [vmem:[%s3081_s0 + $0xb8] sm:$0xff] }
 0x60a   :  { %v1465_v54 = vmul.f32 -1.442695, %v1074_v51 }
 0x60b   :  { %2396 = vpow2.f32 %v1464_v49 }
 0x60c   :  { %2398 = vpow2.f32 %v1465_v54 }
 0x615   :  { %v2397_v5 = vpop.eup %2396 }
 0x616   :  { %v1071_v55 = vadd.f32 1.0, %v2397_v5  ;;  %v2399_v56 = vpop.eup %2398 }
 0x617   :  { %v1078_v57 = vadd.f32 1.0, %v2399_v56 }
 0x618   :  { %2400 = vrcp.f32 %v1071_v55 }
 0x619   :  { %2402 = vrcp.f32 %v1078_v57 }
 0x622   :  { %v2401_v60 = vpop.eup %2400 }
 0x623   :  { %v1082_v0 = vmul.f32 %v2401_v60, %v1081_v58  ;;  %v2403_v7 = vpop.eup %2402 }
 0x624   :  { %v1085_v8 = vsub.f32 1.0, %v2403_v7  ;;  %v1087_v14 = vmul.f32 %v2403_v7, %v2957_v38 }
 0x625   :  { %v1083_v1 = vadd.f32 %v1463_v63, %v1082_v0 }
 0x627   :  { %2404 = vtanh.f32 %v1083_v1 }
 0x631   :  { %v2405_v11 = vpop.eup %2404 }
 0x632   :  { %v1086_v13 = vmul.f32 %v2405_v11, %v1085_v8 }
 0x634   :  { %v3011_v18 = vadd.f32 %v1087_v14, %v1086_v13 }
 0x636   :  { %1466 = vst [vmem:[%s3083_s4 + $0x28] sm:$0xff] %v3011_v18  ;;  %1156 = vmatmul.mubr.f32.vlgmr.msra.gmra.mrb[12].mxu0 %v3011_v18  ;;  %1858 = vmatmul.mubr.f32.vlgmr.msra.gmra.mrb[12].mxu1 %v3011_v18 }
 0x637   :  { %2290 = vmatpush1.bf16.msra.mxu0 %v2478_v9  ;;  %2321 = vmatpush3.bf16.msra.mxu1 %v2537_v29 }
 0x638   :  { %2292 = vmatprep.subr.bf16.mxu0 %v2480_v10  ;;  %2322 = vmatprep.subr.bf16.mxu1 %v2426_v3 }
 0x639   :  { %1324 = vmatprep.mubr.f32.mxu0 %v2427_v4  ;;  %1892 = vmatprep.mubr.msk.f32.mxu1 %vm2428_vm0, %v2427_v4  ;;  %v1467_v4 = vld [vmem:[%s3081_s0 + $0x90] sm:$0xff] }
 0x63b   :  { %2294 = vmatpush1.bf16.msra.mxu0 %v2496_v15  ;;  %2324 = vmatpush3.bf16.msra.mxu1 %v2552_v34 }
 0x63c   :  { %2296 = vmatprep.subr.bf16.mxu0 %v2499_v16  ;;  %2325 = vmatprep.subr.bf16.mxu1 %v2426_v3 }
 0x63f   :  { %2298 = vmatpush1.bf16.msra.mxu0 %v2514_v21  ;;  %2327 = vmatpush3.bf16.msra.mxu1 %v2580_v43  ;;  %v1468_v21 = vld [vmem:[%s3081_s0 + $0x98] sm:$0xff] }
 0x640   :  { %2300 = vmatprep.subr.bf16.mxu0 %v2520_v23  ;;  %2328 = vmatprep.subr.bf16.mxu1 %v2426_v3 }
 0x643   :  { %2302 = vmatpush1.bf16.msra.mxu0 %v2546_v32  ;;  %2330 = vmatpush3.bf16.msra.mxu1 %v2608_v52  ;;  %v1469_v52 = vld [vmem:[%s3081_s0 + $0xa0] sm:$0xff] }
 0x644   :  { %2304 = vmatprep.subr.bf16.mxu0 %v2555_v35  ;;  %2331 = vmatprep.subr.bf16.mxu1 %v2426_v3 }
 0x647   :  { %2306 = vmatpush1.bf16.msra.mxu0 %v2574_v41  ;;  %2333 = vmatpush3.bf16.msra.mxu1 %v2636_v61 }
 0x648   :  { %2308 = vmatprep.subr.bf16.mxu0 %v2583_v44  ;;  %2334 = vmatprep.subr.bf16.mxu1 %v2426_v3 }
 0x64b   :  { %2310 = vmatpush1.bf16.msra.mxu0 %v2602_v50  ;;  %2336 = vmatpush3.bf16.msra.mxu1 %v2655_v6 }
 0x64c   :  { %2312 = vmatprep.subr.bf16.mxu0 %v2611_v53  ;;  %2337 = vmatprep.subr.bf16.mxu1 %v2426_v3 }
 0x64f   :  { %2314 = vmatpush1.bf16.msra.mxu0 %v2630_v59  ;;  %2339 = vmatpush3.bf16.msra.mxu1 %v2672_v12 }
 0x650   :  { %2316 = vmatprep.subr.bf16.mxu0 %v2639_v62  ;;  %2340 = vmatprep.subr.bf16.mxu1 %v2426_v3 }
 0x653   :  { %2318 = vmatpush1.bf16.msra.mxu0 %v2652_v2  ;;  %2342 = vmatpush3.bf16.msra.mxu1 %v2684_v17 }
 0x709   :  { %v1157_v9 = vpop.f32.mrb[12].mxu0  ;;  %v1228_v10 = vpop.f32.mrb[12].mxu1 }
 0x70a   :  { %v1236_v15 = vadd.f32 %v1467_v4, %v1157_v9  ;;  %v1159_v16 = vpop.f32.mrb[13].mxu0  ;;  %v1859_v23 = vpop.f32.mrb[13].mxu1  ;;  %v1250_v44 = vadd.f32 %v2734_v37, %v1228_v10 }
 0x70b   :  { %v1243_v32 = vadd.f32 %v1468_v21, %v1159_v16 }
 0x70c   :  { %v1470_v29 = vmul.f32 -1.442695, %v1236_v15 }
 0x70d   :  { %v1471_v3 = vmul.f32 -1.442695, %v1243_v32 }
 0x70e   :  { %2406 = vpow2.f32 %v1470_v29 }
 0x70f   :  { %2408 = vpow2.f32 %v1471_v3 }
 0x718   :  { %v2407_v34 = vpop.eup %2406 }
 0x719   :  { %v1240_v35 = vadd.f32 1.0, %v2407_v34  ;;  %v2409_v41 = vpop.eup %2408 }
 0x71a   :  { %v1247_v43 = vadd.f32 1.0, %v2409_v41 }
 0x71b   :  { %2410 = vrcp.f32 %v1240_v35 }
 0x71c   :  { %2412 = vrcp.f32 %v1247_v43 }
 0x725   :  { %v2411_v50 = vpop.eup %2410 }
 0x726   :  { %v1251_v53 = vmul.f32 %v2411_v50, %v1250_v44  ;;  %v2413_v61 = vpop.eup %2412 }
 0x727   :  { %v1254_v62 = vsub.f32 1.0, %v2413_v61  ;;  %v1256_v12 = vmul.f32 %v2413_v61, %v3011_v18 }
 0x728   :  { %v1252_v59 = vadd.f32 %v1469_v52, %v1251_v53 }
 0x72a   :  { %2414 = vtanh.f32 %v1252_v59 }
 0x734   :  { %v2415_v2 = vpop.eup %2414 }
 0x735   :  { %v1255_v6 = vmul.f32 %v2415_v2, %v1254_v62 }
 0x737   :  { %v1257_v17 = vadd.f32 %v1256_v12, %v1255_v6 }
 0x739   :  { %1472 = vst [vmem:[%s3083_s4 + $0x30] sm:$0xff] %v1257_v17  ;;  %1325 = vmatmul.mubr.f32.vlgmr.msra.gmra.mrb[14].mxu0 %v1257_v17  ;;  %1893 = vmatmul.mubr.f32.vlgmr.msra.gmra.mrb[14].mxu1 %v1257_v17 }
 0x80c   :  { %v1326_v20 = vpop.f32.mrb[14].mxu0  ;;  %v1397_v22 = vpop.f32.mrb[14].mxu1 }
 0x80d   :  { %v1405_v24 = vadd.f32 %v1473_v19, %v1326_v20  ;;  %v1328_v25 = vpop.f32.mrb[15].mxu0  ;;  %v1894_v27 = vpop.f32.mrb[15].mxu1  ;;  %v1419_v40 = vadd.f32 %v2734_v37, %v1397_v22 }
 0x80e   :  { %v1412_v30 = vadd.f32 %v1474_v26, %v1328_v25 }
 0x80f   :  { %v1476_v28 = vmul.f32 -1.442695, %v1405_v24 }
 0x810   :  { %v1477_v31 = vmul.f32 -1.442695, %v1412_v30 }
 0x811   :  { %2416 = vpow2.f32 %v1476_v28 }
 0x812   :  { %2418 = vpow2.f32 %v1477_v31 }
 0x81b   :  { %v2417_v33 = vpop.eup %2416 }
 0x81c   :  { %v1409_v36 = vadd.f32 1.0, %v2417_v33  ;;  %v2419_v38 = vpop.eup %2418 }
 0x81d   :  { %v1416_v39 = vadd.f32 1.0, %v2419_v38 }
 0x81e   :  { %2420 = vrcp.f32 %v1409_v36 }
 0x81f   :  { %2422 = vrcp.f32 %v1416_v39 }
 0x828   :  { %v2421_v42 = vpop.eup %2420 }
 0x829   :  { %v1420_v46 = vmul.f32 %v2421_v42, %v1419_v40  ;;  %v2423_v48 = vpop.eup %2422 }
 0x82a   :  { %v1423_v49 = vsub.f32 1.0, %v2423_v48  ;;  %v1425_v5 = vmul.f32 %v2423_v48, %v1257_v17 }
 0x82b   :  { %v1421_v47 = vadd.f32 %v1475_v45, %v1420_v46 }
 0x82d   :  { %2424 = vtanh.f32 %v1421_v47 }
 0x837   :  { %v2425_v51 = vpop.eup %2424 }
 0x838   :  { %v1424_v54 = vmul.f32 %v2425_v51, %v1423_v49 }
 0x83a   :  { %v1426_v55 = vadd.f32 %v1425_v5, %v1424_v54 }
 0x83c   :  { %1478 = vst [vmem:[%s3083_s4 + $0x38] sm:$0xff] %v1426_v55 }

</bundles_post_ra>
